<compile_context>
chip_gen: v7x
topology: tpu7x:2x2x1
jax: 0.10.0
libtpu: 0.0.40
codegen_flags: <defaults>
</compile_context>

<pallas_src>
import jax
import jax.numpy as jnp
from jax.experimental import pallas as pl
from jax.experimental.pallas import tpu as pltpu


def _round_up(x, m):
    return ((x + m - 1) // m) * m


def lstm_fc_kernel(emb_ref, wih_ref, whh_ref, bias_ref, wfc_ref, bfc_ref,
                   logits_ref, hn_ref, cn_ref, hs_ref):
    """Whole sequence in one invocation.  PyTorch gate order (i, f, g, o).

    Shapes (all padded):
      emb_ref    (T*Bp, E)    time-major embedded inputs, flattened
      wih_ref    (E, 4*Hp)    W_ih^T, per-gate zero-padded to Hp lanes
      whh_ref    (Hp, 4*Hp)   W_hh^T, per-gate zero-padded
      bias_ref   (1, 4*Hp)    b_ih + b_hh, per-gate zero-padded
      wfc_ref    (Hp, Vp)     W_fc^T, zero-padded
      bfc_ref    (1, Vp)
      logits_ref (T*Bp, Vp)
      hn_ref     (Bp, Hp)
      cn_ref     (Bp, Hp)
      hs_ref     (T*Bp, Hp)   VMEM scratch: per-step hidden states
    """
    Bp, Hp = hn_ref.shape
    T = emb_ref.shape[0] // Bp

    # Hoisted input projection + bias: one MXU pass covering all time steps.
    gates_x = (jnp.dot(emb_ref[...], wih_ref[...],
                       preferred_element_type=jnp.float32)
               + bias_ref[...])                            # (T*Bp, 4Hp)
    whh = whh_ref[...]                                     # (Hp, 4Hp)

    # hidden=None in the PyTorch forward -> zero initial state.
    h = jnp.zeros((Bp, Hp), jnp.float32)
    c = jnp.zeros((Bp, Hp), jnp.float32)

    # Static Python loop == fully unrolled; only the recurrent matmul and the
    # gate nonlinearities sit on the serial critical path.  All slices below
    # are 128-lane aligned whole-vreg reads thanks to the Hp padding.
    for t in range(T):
        g = gates_x[t * Bp:(t + 1) * Bp, :] + jnp.dot(
            h, whh, preferred_element_type=jnp.float32)    # (Bp, 4Hp)
        i_g = jax.nn.sigmoid(g[:, 0 * Hp:1 * Hp])
        f_g = jax.nn.sigmoid(g[:, 1 * Hp:2 * Hp])
        g_g = jnp.tanh(g[:, 2 * Hp:3 * Hp])
        o_g = jax.nn.sigmoid(g[:, 3 * Hp:4 * Hp])
        c = f_g * c + i_g * g_g
        h = o_g * jnp.tanh(c)
        hs_ref[t * Bp:(t + 1) * Bp, :] = h                 # tile-aligned store

    # Final LSTM state: written exactly once (after the recurrence).
    hn_ref[...] = h
    cn_ref[...] = c

    # Batched output projection: one MXU pass + one lane-dense store.
    logits_ref[...] = (jnp.dot(hs_ref[...], wfc_ref[...],
                               preferred_element_type=jnp.float32)
                       + bfc_ref[...])


def name_generator_forward(x_tokens, params):
    """x_tokens: int32 (B, T).  Returns (output (B, T, V), (h_n, c_n))."""
    emb_table = params["embedding"]            # (V, E)
    w_ih_t = params["w_ih_t"]                  # (E, 4H)
    w_hh_t = params["w_hh_t"]                  # (H, 4H)
    bias = params["bias"]                      # (1, 4H)  == b_ih + b_hh
    w_fc_t = params["w_fc_t"]                  # (H, V)
    b_fc = params["b_fc"]                      # (1, V)

    B, T = x_tokens.shape
    V, E = emb_table.shape
    H = w_hh_t.shape[0]

    Bp = _round_up(max(B, 1), 8)               # f32 sublane tile
    Hp = _round_up(H, 128)                     # lane-aligned gate blocks
    Vp = _round_up(V, 128)                     # lane-dense logits store

    # --- parameter padding (per-gate, so each gate block is 128-lane aligned;
    #     zero padding keeps padded h/c columns identically zero) ---
    w_ih_p = jnp.pad(w_ih_t.reshape(E, 4, H),
                     ((0, 0), (0, 0), (0, Hp - H))).reshape(E, 4 * Hp)
    w_hh_p = jnp.pad(w_hh_t.reshape(H, 4, H),
                     ((0, Hp - H), (0, 0), (0, Hp - H))).reshape(Hp, 4 * Hp)
    bias_p = jnp.pad(bias.reshape(1, 4, H),
                     ((0, 0), (0, 0), (0, Hp - H))).reshape(1, 4 * Hp)
    w_fc_p = jnp.pad(w_fc_t, ((0, Hp - H), (0, Vp - V)))
    b_fc_p = jnp.pad(b_fc, ((0, 0), (0, Vp - V)))

    # Embedding lookup (glue) -> time-major, batch-padded, flattened.
    # TODO(synk): could be pulled in-kernel via scalar-prefetched token ids to
    # save one XLA gather+transpose dispatch; kept in JAX for simplicity.
    embeds = jnp.take(emb_table, x_tokens, axis=0)         # (B, T, E)
    embeds_tm = jnp.transpose(embeds, (1, 0, 2))           # (T, B, E)
    embeds_tm = jnp.pad(embeds_tm, ((0, 0), (0, Bp - B), (0, 0)))
    emb_flat = embeds_tm.reshape(T * Bp, E)                # (T*Bp, E)

    vmem = pl.BlockSpec(memory_space=pltpu.MemorySpace.VMEM)

    logits_flat, h_n_p, c_n_p = pl.pallas_call(
        lstm_fc_kernel,
        out_shape=(
            jax.ShapeDtypeStruct((T * Bp, Vp), jnp.float32),
            jax.ShapeDtypeStruct((Bp, Hp), jnp.float32),
            jax.ShapeDtypeStruct((Bp, Hp), jnp.float32),
        ),
        in_specs=[vmem] * 6,
        out_specs=(vmem, vmem, vmem),
        scratch_shapes=[pltpu.VMEM((T * Bp, Hp), jnp.float32)],
    )(emb_flat, w_ih_p, w_hh_p, bias_p, w_fc_p, b_fc_p)

    logits = logits_flat.reshape(T, Bp, Vp)[:, :B, :V]     # (T, B, V)
    output = jnp.transpose(logits, (1, 0, 2))              # (B, T, V)
    # PyTorch nn.LSTM returns hidden with a leading num_layers dim (=1).
    hidden = (h_n_p[None, :B, :H], c_n_p[None, :B, :H])
    return output, hidden


def init_params(key, vocab_size, embedding_dim, hidden_dim):
    k = jax.random.split(key, 6)
    scale = 0.1
    emb = scale * jax.random.normal(k[0], (vocab_size, embedding_dim), jnp.float32)
    w_ih = scale * jax.random.normal(k[1], (4 * hidden_dim, embedding_dim), jnp.float32)
    w_hh = scale * jax.random.normal(k[2], (4 * hidden_dim, hidden_dim), jnp.float32)
    b_ih = scale * jax.random.normal(k[3], (4 * hidden_dim,), jnp.float32)
    b_hh = scale * jax.random.normal(k[4], (4 * hidden_dim,), jnp.float32)
    w_fc = scale * jax.random.normal(k[5], (vocab_size, hidden_dim), jnp.float32)
    b_fc = jnp.zeros((vocab_size,), jnp.float32)
    return {
        "embedding": emb,
        "w_ih_t": w_ih.T,                     # (E, 4H)
        "w_hh_t": w_hh.T,                     # (H, 4H)
        "bias": (b_ih + b_hh)[None, :],       # (1, 4H)
        "w_fc_t": w_fc.T,                     # (H, V)
        "b_fc": b_fc[None, :],                # (1, V)
    }


def reference_forward(x_tokens, params):
    """Pure-JAX reference (lax.scan LSTM) for a correctness check."""
    emb = jnp.take(params["embedding"], x_tokens, axis=0)  # (B, T, E)
    H = params["w_hh_t"].shape[0]
    B = x_tokens.shape[0]

    def step(carry, x_t):
        h, c = carry
        gates = x_t @ params["w_ih_t"] + h @ params["w_hh_t"] + params["bias"]
        i = jax.nn.sigmoid(gates[:, 0 * H:1 * H])
        f = jax.nn.sigmoid(gates[:, 1 * H:2 * H])
        g = jnp.tanh(gates[:, 2 * H:3 * H])
        o = jax.nn.sigmoid(gates[:, 3 * H:4 * H])
        c = f * c + i * g
        h = o * jnp.tanh(c)
        return (h, c), h

    h0 = jnp.zeros((B, H), jnp.float32)
    c0 = jnp.zeros((B, H), jnp.float32)
    (h_n, c_n), hs = jax.lax.scan(step, (h0, c0), jnp.transpose(emb, (1, 0, 2)))
    logits = hs @ params["w_fc_t"] + params["b_fc"]        # (T, B, V)
    return jnp.transpose(logits, (1, 0, 2)), (h_n[None], c_n[None])


if __name__ == "__main__":
    VOCAB, EMBED, HIDDEN = 28, 32, 64
    B, T = 2, 8

    key = jax.random.PRNGKey(0)
    pkey, xkey = jax.random.split(key)
    params = init_params(pkey, VOCAB, EMBED, HIDDEN)
    x = jax.random.randint(xkey, (B, T), 0, VOCAB, dtype=jnp.int32)

    output, (h_n, c_n) = name_generator_forward(x, params)
    jax.block_until_ready((output, h_n, c_n))

    ref_out, (ref_h, ref_c) = reference_forward(x, params)
    assert output.shape == (B, T, VOCAB)
    assert h_n.shape == (1, B, HIDDEN) and c_n.shape == (1, B, HIDDEN)
    assert jnp.allclose(output, ref_out, atol=1e-5, rtol=1e-5)
    assert jnp.allclose(h_n, ref_h, atol=1e-5, rtol=1e-5)
    assert jnp.allclose(c_n, ref_c, atol=1e-5, rtol=1e-5)

    print("KERNEL_OK")
</pallas_src>

<mosaic_0001>
module attributes {stable_mosaic.version = 11 : i64} {
  func.func @lstm_fc_kernel(%arg0: memref<64x32xf32, #tpu.memory_space<vmem>>, %arg1: memref<32x512xf32, #tpu.memory_space<vmem>>, %arg2: memref<128x512xf32, #tpu.memory_space<vmem>>, %arg3: memref<1x512xf32, #tpu.memory_space<vmem>>, %arg4: memref<128x128xf32, #tpu.memory_space<vmem>>, %arg5: memref<1x128xf32, #tpu.memory_space<vmem>>, %arg6: memref<64x128xf32, #tpu.memory_space<vmem>>, %arg7: memref<8x128xf32, #tpu.memory_space<vmem>>, %arg8: memref<8x128xf32, #tpu.memory_space<vmem>>, %arg9: memref<64x128xf32, #tpu.memory_space<vmem>>) attributes {dimension_semantics = [], scalar_prefetch = 0 : i64, scratch_operands = 1 : i64, tpu.core_type = #tpu.core_type<tc>} {
    %c0 = arith.constant 0 : index
    %c0_0 = arith.constant 0 : index
    %0 = vector.load %arg0[%c0, %c0_0] : memref<64x32xf32, #tpu.memory_space<vmem>>, vector<64x32xf32>
    %c0_1 = arith.constant 0 : index
    %c0_2 = arith.constant 0 : index
    %1 = vector.load %arg1[%c0_1, %c0_2] : memref<32x512xf32, #tpu.memory_space<vmem>>, vector<32x512xf32>
    %cst = arith.constant dense<0.000000e+00> : vector<64x512xf32>
    %2 = tpu.matmul %0, %1, %cst {dimension_numbers = #tpu.dot_dimension_numbers<[1], [0], [0], [1], [0, 0, 1, 1], [], []>} : vector<64x32xf32>, vector<32x512xf32>, vector<64x512xf32> -> vector<64x512xf32>
    %c0_3 = arith.constant 0 : index
    %c0_4 = arith.constant 0 : index
    %3 = vector.load %arg3[%c0_3, %c0_4] : memref<1x512xf32, #tpu.memory_space<vmem>>, vector<1x512xf32>
    %4 = vector.broadcast %3 : vector<1x512xf32> to vector<64x512xf32>
    %5 = arith.addf %2, %4 : vector<64x512xf32>
    %c0_5 = arith.constant 0 : index
    %c0_6 = arith.constant 0 : index
    %6 = vector.load %arg2[%c0_5, %c0_6] : memref<128x512xf32, #tpu.memory_space<vmem>>, vector<128x512xf32>
    %cst_7 = arith.constant 0.000000e+00 : f32
    %7 = vector.broadcast %cst_7 : f32 to vector<8x128xf32>
    %cst_8 = arith.constant 0.000000e+00 : f32
    %8 = vector.broadcast %cst_8 : f32 to vector<8x128xf32>
    %9 = vector.extract_strided_slice %5 {offsets = [0, 0], sizes = [8, 512], strides = [1, 1]} : vector<64x512xf32> to vector<8x512xf32>
    %cst_9 = arith.constant dense<0.000000e+00> : vector<8x512xf32>
    %10 = tpu.matmul %7, %6, %cst_9 {dimension_numbers = #tpu.dot_dimension_numbers<[1], [0], [0], [1], [0, 0, 1, 1], [], []>} : vector<8x128xf32>, vector<128x512xf32>, vector<8x512xf32> -> vector<8x512xf32>
    %11 = arith.addf %9, %10 : vector<8x512xf32>
    %12 = vector.extract_strided_slice %11 {offsets = [0, 0], sizes = [8, 128], strides = [1, 1]} : vector<8x512xf32> to vector<8x128xf32>
    %13 = arith.negf %12 : vector<8x128xf32>
    %14 = math.exp %13 : vector<8x128xf32>
    %cst_10 = arith.constant 1.000000e+00 : f32
    %15 = vector.broadcast %cst_10 : f32 to vector<8x128xf32>
    %16 = arith.addf %15, %14 : vector<8x128xf32>
    %17 = arith.divf %15, %16 : vector<8x128xf32>
    %18 = vector.extract_strided_slice %11 {offsets = [0, 128], sizes = [8, 128], strides = [1, 1]} : vector<8x512xf32> to vector<8x128xf32>
    %19 = arith.negf %18 : vector<8x128xf32>
    %20 = math.exp %19 : vector<8x128xf32>
    %cst_11 = arith.constant 1.000000e+00 : f32
    %21 = vector.broadcast %cst_11 : f32 to vector<8x128xf32>
    %22 = arith.addf %21, %20 : vector<8x128xf32>
    %23 = arith.divf %21, %22 : vector<8x128xf32>
    %24 = vector.extract_strided_slice %11 {offsets = [0, 256], sizes = [8, 128], strides = [1, 1]} : vector<8x512xf32> to vector<8x128xf32>
    %25 = math.tanh %24 : vector<8x128xf32>
    %26 = vector.extract_strided_slice %11 {offsets = [0, 384], sizes = [8, 128], strides = [1, 1]} : vector<8x512xf32> to vector<8x128xf32>
    %27 = arith.negf %26 : vector<8x128xf32>
    %28 = math.exp %27 : vector<8x128xf32>
    %cst_12 = arith.constant 1.000000e+00 : f32
    %29 = vector.broadcast %cst_12 : f32 to vector<8x128xf32>
    %30 = arith.addf %29, %28 : vector<8x128xf32>
    %31 = arith.divf %29, %30 : vector<8x128xf32>
    %32 = arith.mulf %23, %8 : vector<8x128xf32>
    %33 = arith.mulf %17, %25 : vector<8x128xf32>
    %34 = arith.addf %32, %33 : vector<8x128xf32>
    %35 = math.tanh %34 : vector<8x128xf32>
    %36 = arith.mulf %31, %35 : vector<8x128xf32>
    %c0_13 = arith.constant 0 : index
    %c0_14 = arith.constant 0 : index
    %37 = vector.load %arg9[%c0_13, %c0_14] : memref<64x128xf32, #tpu.memory_space<vmem>>, vector<8x128xf32>
    tpu.vector_store %arg9[%c0_13, %c0_14], %36 {strides = array<i32>} : memref<64x128xf32, #tpu.memory_space<vmem>>, vector<8x128xf32>,
    %38 = vector.extract_strided_slice %5 {offsets = [8, 0], sizes = [8, 512], strides = [1, 1]} : vector<64x512xf32> to vector<8x512xf32>
    %cst_15 = arith.constant dense<0.000000e+00> : vector<8x512xf32>
    %39 = tpu.matmul %36, %6, %cst_15 {dimension_numbers = #tpu.dot_dimension_numbers<[1], [0], [0], [1], [0, 0, 1, 1], [], []>} : vector<8x128xf32>, vector<128x512xf32>, vector<8x512xf32> -> vector<8x512xf32>
    %40 = arith.addf %38, %39 : vector<8x512xf32>
    %41 = vector.extract_strided_slice %40 {offsets = [0, 0], sizes = [8, 128], strides = [1, 1]} : vector<8x512xf32> to vector<8x128xf32>
    %42 = arith.negf %41 : vector<8x128xf32>
    %43 = math.exp %42 : vector<8x128xf32>
    %cst_16 = arith.constant 1.000000e+00 : f32
    %44 = vector.broadcast %cst_16 : f32 to vector<8x128xf32>
    %45 = arith.addf %44, %43 : vector<8x128xf32>
    %46 = arith.divf %44, %45 : vector<8x128xf32>
    %47 = vector.extract_strided_slice %40 {offsets = [0, 128], sizes = [8, 128], strides = [1, 1]} : vector<8x512xf32> to vector<8x128xf32>
    %48 = arith.negf %47 : vector<8x128xf32>
    %49 = math.exp %48 : vector<8x128xf32>
    %cst_17 = arith.constant 1.000000e+00 : f32
    %50 = vector.broadcast %cst_17 : f32 to vector<8x128xf32>
    %51 = arith.addf %50, %49 : vector<8x128xf32>
    %52 = arith.divf %50, %51 : vector<8x128xf32>
    %53 = vector.extract_strided_slice %40 {offsets = [0, 256], sizes = [8, 128], strides = [1, 1]} : vector<8x512xf32> to vector<8x128xf32>
    %54 = math.tanh %53 : vector<8x128xf32>
    %55 = vector.extract_strided_slice %40 {offsets = [0, 384], sizes = [8, 128], strides = [1, 1]} : vector<8x512xf32> to vector<8x128xf32>
    %56 = arith.negf %55 : vector<8x128xf32>
    %57 = math.exp %56 : vector<8x128xf32>
    %cst_18 = arith.constant 1.000000e+00 : f32
    %58 = vector.broadcast %cst_18 : f32 to vector<8x128xf32>
    %59 = arith.addf %58, %57 : vector<8x128xf32>
    %60 = arith.divf %58, %59 : vector<8x128xf32>
    %61 = arith.mulf %52, %34 : vector<8x128xf32>
    %62 = arith.mulf %46, %54 : vector<8x128xf32>
    %63 = arith.addf %61, %62 : vector<8x128xf32>
    %64 = math.tanh %63 : vector<8x128xf32>
    %65 = arith.mulf %60, %64 : vector<8x128xf32>
    %c8 = arith.constant 8 : index
    %c0_19 = arith.constant 0 : index
    %66 = vector.load %arg9[%c8, %c0_19] : memref<64x128xf32, #tpu.memory_space<vmem>>, vector<8x128xf32>
    tpu.vector_store %arg9[%c8, %c0_19], %65 {strides = array<i32>} : memref<64x128xf32, #tpu.memory_space<vmem>>, vector<8x128xf32>,
    %67 = vector.extract_strided_slice %5 {offsets = [16, 0], sizes = [8, 512], strides = [1, 1]} : vector<64x512xf32> to vector<8x512xf32>
    %cst_20 = arith.constant dense<0.000000e+00> : vector<8x512xf32>
    %68 = tpu.matmul %65, %6, %cst_20 {dimension_numbers = #tpu.dot_dimension_numbers<[1], [0], [0], [1], [0, 0, 1, 1], [], []>} : vector<8x128xf32>, vector<128x512xf32>, vector<8x512xf32> -> vector<8x512xf32>
    %69 = arith.addf %67, %68 : vector<8x512xf32>
    %70 = vector.extract_strided_slice %69 {offsets = [0, 0], sizes = [8, 128], strides = [1, 1]} : vector<8x512xf32> to vector<8x128xf32>
    %71 = arith.negf %70 : vector<8x128xf32>
    %72 = math.exp %71 : vector<8x128xf32>
    %cst_21 = arith.constant 1.000000e+00 : f32
    %73 = vector.broadcast %cst_21 : f32 to vector<8x128xf32>
    %74 = arith.addf %73, %72 : vector<8x128xf32>
    %75 = arith.divf %73, %74 : vector<8x128xf32>
    %76 = vector.extract_strided_slice %69 {offsets = [0, 128], sizes = [8, 128], strides = [1, 1]} : vector<8x512xf32> to vector<8x128xf32>
    %77 = arith.negf %76 : vector<8x128xf32>
    %78 = math.exp %77 : vector<8x128xf32>
    %cst_22 = arith.constant 1.000000e+00 : f32
    %79 = vector.broadcast %cst_22 : f32 to vector<8x128xf32>
    %80 = arith.addf %79, %78 : vector<8x128xf32>
    %81 = arith.divf %79, %80 : vector<8x128xf32>
    %82 = vector.extract_strided_slice %69 {offsets = [0, 256], sizes = [8, 128], strides = [1, 1]} : vector<8x512xf32> to vector<8x128xf32>
    %83 = math.tanh %82 : vector<8x128xf32>
    %84 = vector.extract_strided_slice %69 {offsets = [0, 384], sizes = [8, 128], strides = [1, 1]} : vector<8x512xf32> to vector<8x128xf32>
    %85 = arith.negf %84 : vector<8x128xf32>
    %86 = math.exp %85 : vector<8x128xf32>
    %cst_23 = arith.constant 1.000000e+00 : f32
    %87 = vector.broadcast %cst_23 : f32 to vector<8x128xf32>
    %88 = arith.addf %87, %86 : vector<8x128xf32>
    %89 = arith.divf %87, %88 : vector<8x128xf32>
    %90 = arith.mulf %81, %63 : vector<8x128xf32>
    %91 = arith.mulf %75, %83 : vector<8x128xf32>
    %92 = arith.addf %90, %91 : vector<8x128xf32>
    %93 = math.tanh %92 : vector<8x128xf32>
    %94 = arith.mulf %89, %93 : vector<8x128xf32>
    %c16 = arith.constant 16 : index
    %c0_24 = arith.constant 0 : index
    %95 = vector.load %arg9[%c16, %c0_24] : memref<64x128xf32, #tpu.memory_space<vmem>>, vector<8x128xf32>
    tpu.vector_store %arg9[%c16, %c0_24], %94 {strides = array<i32>} : memref<64x128xf32, #tpu.memory_space<vmem>>, vector<8x128xf32>,
    %96 = vector.extract_strided_slice %5 {offsets = [24, 0], sizes = [8, 512], strides = [1, 1]} : vector<64x512xf32> to vector<8x512xf32>
    %cst_25 = arith.constant dense<0.000000e+00> : vector<8x512xf32>
    %97 = tpu.matmul %94, %6, %cst_25 {dimension_numbers = #tpu.dot_dimension_numbers<[1], [0], [0], [1], [0, 0, 1, 1], [], []>} : vector<8x128xf32>, vector<128x512xf32>, vector<8x512xf32> -> vector<8x512xf32>
    %98 = arith.addf %96, %97 : vector<8x512xf32>
    %99 = vector.extract_strided_slice %98 {offsets = [0, 0], sizes = [8, 128], strides = [1, 1]} : vector<8x512xf32> to vector<8x128xf32>
    %100 = arith.negf %99 : vector<8x128xf32>
    %101 = math.exp %100 : vector<8x128xf32>
    %cst_26 = arith.constant 1.000000e+00 : f32
    %102 = vector.broadcast %cst_26 : f32 to vector<8x128xf32>
    %103 = arith.addf %102, %101 : vector<8x128xf32>
    %104 = arith.divf %102, %103 : vector<8x128xf32>
    %105 = vector.extract_strided_slice %98 {offsets = [0, 128], sizes = [8, 128], strides = [1, 1]} : vector<8x512xf32> to vector<8x128xf32>
    %106 = arith.negf %105 : vector<8x128xf32>
    %107 = math.exp %106 : vector<8x128xf32>
    %cst_27 = arith.constant 1.000000e+00 : f32
    %108 = vector.broadcast %cst_27 : f32 to vector<8x128xf32>
    %109 = arith.addf %108, %107 : vector<8x128xf32>
    %110 = arith.divf %108, %109 : vector<8x128xf32>
    %111 = vector.extract_strided_slice %98 {offsets = [0, 256], sizes = [8, 128], strides = [1, 1]} : vector<8x512xf32> to vector<8x128xf32>
    %112 = math.tanh %111 : vector<8x128xf32>
    %113 = vector.extract_strided_slice %98 {offsets = [0, 384], sizes = [8, 128], strides = [1, 1]} : vector<8x512xf32> to vector<8x128xf32>
    %114 = arith.negf %113 : vector<8x128xf32>
    %115 = math.exp %114 : vector<8x128xf32>
    %cst_28 = arith.constant 1.000000e+00 : f32
    %116 = vector.broadcast %cst_28 : f32 to vector<8x128xf32>
    %117 = arith.addf %116, %115 : vector<8x128xf32>
    %118 = arith.divf %116, %117 : vector<8x128xf32>
    %119 = arith.mulf %110, %92 : vector<8x128xf32>
    %120 = arith.mulf %104, %112 : vector<8x128xf32>
    %121 = arith.addf %119, %120 : vector<8x128xf32>
    %122 = math.tanh %121 : vector<8x128xf32>
    %123 = arith.mulf %118, %122 : vector<8x128xf32>
    %c24 = arith.constant 24 : index
    %c0_29 = arith.constant 0 : index
    %124 = vector.load %arg9[%c24, %c0_29] : memref<64x128xf32, #tpu.memory_space<vmem>>, vector<8x128xf32>
    tpu.vector_store %arg9[%c24, %c0_29], %123 {strides = array<i32>} : memref<64x128xf32, #tpu.memory_space<vmem>>, vector<8x128xf32>,
    %125 = vector.extract_strided_slice %5 {offsets = [32, 0], sizes = [8, 512], strides = [1, 1]} : vector<64x512xf32> to vector<8x512xf32>
    %cst_30 = arith.constant dense<0.000000e+00> : vector<8x512xf32>
    %126 = tpu.matmul %123, %6, %cst_30 {dimension_numbers = #tpu.dot_dimension_numbers<[1], [0], [0], [1], [0, 0, 1, 1], [], []>} : vector<8x128xf32>, vector<128x512xf32>, vector<8x512xf32> -> vector<8x512xf32>
    %127 = arith.addf %125, %126 : vector<8x512xf32>
    %128 = vector.extract_strided_slice %127 {offsets = [0, 0], sizes = [8, 128], strides = [1, 1]} : vector<8x512xf32> to vector<8x128xf32>
    %129 = arith.negf %128 : vector<8x128xf32>
    %130 = math.exp %129 : vector<8x128xf32>
    %cst_31 = arith.constant 1.000000e+00 : f32
    %131 = vector.broadcast %cst_31 : f32 to vector<8x128xf32>
    %132 = arith.addf %131, %130 : vector<8x128xf32>
    %133 = arith.divf %131, %132 : vector<8x128xf32>
    %134 = vector.extract_strided_slice %127 {offsets = [0, 128], sizes = [8, 128], strides = [1, 1]} : vector<8x512xf32> to vector<8x128xf32>
    %135 = arith.negf %134 : vector<8x128xf32>
    %136 = math.exp %135 : vector<8x128xf32>
    %cst_32 = arith.constant 1.000000e+00 : f32
    %137 = vector.broadcast %cst_32 : f32 to vector<8x128xf32>
    %138 = arith.addf %137, %136 : vector<8x128xf32>
    %139 = arith.divf %137, %138 : vector<8x128xf32>
    %140 = vector.extract_strided_slice %127 {offsets = [0, 256], sizes = [8, 128], strides = [1, 1]} : vector<8x512xf32> to vector<8x128xf32>
    %141 = math.tanh %140 : vector<8x128xf32>
    %142 = vector.extract_strided_slice %127 {offsets = [0, 384], sizes = [8, 128], strides = [1, 1]} : vector<8x512xf32> to vector<8x128xf32>
    %143 = arith.negf %142 : vector<8x128xf32>
    %144 = math.exp %143 : vector<8x128xf32>
    %cst_33 = arith.constant 1.000000e+00 : f32
    %145 = vector.broadcast %cst_33 : f32 to vector<8x128xf32>
    %146 = arith.addf %145, %144 : vector<8x128xf32>
    %147 = arith.divf %145, %146 : vector<8x128xf32>
    %148 = arith.mulf %139, %121 : vector<8x128xf32>
    %149 = arith.mulf %133, %141 : vector<8x128xf32>
    %150 = arith.addf %148, %149 : vector<8x128xf32>
    %151 = math.tanh %150 : vector<8x128xf32>
    %152 = arith.mulf %147, %151 : vector<8x128xf32>
    %c32 = arith.constant 32 : index
    %c0_34 = arith.constant 0 : index
    %153 = vector.load %arg9[%c32, %c0_34] : memref<64x128xf32, #tpu.memory_space<vmem>>, vector<8x128xf32>
    tpu.vector_store %arg9[%c32, %c0_34], %152 {strides = array<i32>} : memref<64x128xf32, #tpu.memory_space<vmem>>, vector<8x128xf32>,
    %154 = vector.extract_strided_slice %5 {offsets = [40, 0], sizes = [8, 512], strides = [1, 1]} : vector<64x512xf32> to vector<8x512xf32>
    %cst_35 = arith.constant dense<0.000000e+00> : vector<8x512xf32>
    %155 = tpu.matmul %152, %6, %cst_35 {dimension_numbers = #tpu.dot_dimension_numbers<[1], [0], [0], [1], [0, 0, 1, 1], [], []>} : vector<8x128xf32>, vector<128x512xf32>, vector<8x512xf32> -> vector<8x512xf32>
    %156 = arith.addf %154, %155 : vector<8x512xf32>
    %157 = vector.extract_strided_slice %156 {offsets = [0, 0], sizes = [8, 128], strides = [1, 1]} : vector<8x512xf32> to vector<8x128xf32>
    %158 = arith.negf %157 : vector<8x128xf32>
    %159 = math.exp %158 : vector<8x128xf32>
    %cst_36 = arith.constant 1.000000e+00 : f32
    %160 = vector.broadcast %cst_36 : f32 to vector<8x128xf32>
    %161 = arith.addf %160, %159 : vector<8x128xf32>
    %162 = arith.divf %160, %161 : vector<8x128xf32>
    %163 = vector.extract_strided_slice %156 {offsets = [0, 128], sizes = [8, 128], strides = [1, 1]} : vector<8x512xf32> to vector<8x128xf32>
    %164 = arith.negf %163 : vector<8x128xf32>
    %165 = math.exp %164 : vector<8x128xf32>
    %cst_37 = arith.constant 1.000000e+00 : f32
    %166 = vector.broadcast %cst_37 : f32 to vector<8x128xf32>
    %167 = arith.addf %166, %165 : vector<8x128xf32>
    %168 = arith.divf %166, %167 : vector<8x128xf32>
    %169 = vector.extract_strided_slice %156 {offsets = [0, 256], sizes = [8, 128], strides = [1, 1]} : vector<8x512xf32> to vector<8x128xf32>
    %170 = math.tanh %169 : vector<8x128xf32>
    %171 = vector.extract_strided_slice %156 {offsets = [0, 384], sizes = [8, 128], strides = [1, 1]} : vector<8x512xf32> to vector<8x128xf32>
    %172 = arith.negf %171 : vector<8x128xf32>
    %173 = math.exp %172 : vector<8x128xf32>
    %cst_38 = arith.constant 1.000000e+00 : f32
    %174 = vector.broadcast %cst_38 : f32 to vector<8x128xf32>
    %175 = arith.addf %174, %173 : vector<8x128xf32>
    %176 = arith.divf %174, %175 : vector<8x128xf32>
    %177 = arith.mulf %168, %150 : vector<8x128xf32>
    %178 = arith.mulf %162, %170 : vector<8x128xf32>
    %179 = arith.addf %177, %178 : vector<8x128xf32>
    %180 = math.tanh %179 : vector<8x128xf32>
    %181 = arith.mulf %176, %180 : vector<8x128xf32>
    %c40 = arith.constant 40 : index
    %c0_39 = arith.constant 0 : index
    %182 = vector.load %arg9[%c40, %c0_39] : memref<64x128xf32, #tpu.memory_space<vmem>>, vector<8x128xf32>
    tpu.vector_store %arg9[%c40, %c0_39], %181 {strides = array<i32>} : memref<64x128xf32, #tpu.memory_space<vmem>>, vector<8x128xf32>,
    %183 = vector.extract_strided_slice %5 {offsets = [48, 0], sizes = [8, 512], strides = [1, 1]} : vector<64x512xf32> to vector<8x512xf32>
    %cst_40 = arith.constant dense<0.000000e+00> : vector<8x512xf32>
    %184 = tpu.matmul %181, %6, %cst_40 {dimension_numbers = #tpu.dot_dimension_numbers<[1], [0], [0], [1], [0, 0, 1, 1], [], []>} : vector<8x128xf32>, vector<128x512xf32>, vector<8x512xf32> -> vector<8x512xf32>
    %185 = arith.addf %183, %184 : vector<8x512xf32>
    %186 = vector.extract_strided_slice %185 {offsets = [0, 0], sizes = [8, 128], strides = [1, 1]} : vector<8x512xf32> to vector<8x128xf32>
    %187 = arith.negf %186 : vector<8x128xf32>
    %188 = math.exp %187 : vector<8x128xf32>
    %cst_41 = arith.constant 1.000000e+00 : f32
    %189 = vector.broadcast %cst_41 : f32 to vector<8x128xf32>
    %190 = arith.addf %189, %188 : vector<8x128xf32>
    %191 = arith.divf %189, %190 : vector<8x128xf32>
    %192 = vector.extract_strided_slice %185 {offsets = [0, 128], sizes = [8, 128], strides = [1, 1]} : vector<8x512xf32> to vector<8x128xf32>
    %193 = arith.negf %192 : vector<8x128xf32>
    %194 = math.exp %193 : vector<8x128xf32>
    %cst_42 = arith.constant 1.000000e+00 : f32
    %195 = vector.broadcast %cst_42 : f32 to vector<8x128xf32>
    %196 = arith.addf %195, %194 : vector<8x128xf32>
    %197 = arith.divf %195, %196 : vector<8x128xf32>
    %198 = vector.extract_strided_slice %185 {offsets = [0, 256], sizes = [8, 128], strides = [1, 1]} : vector<8x512xf32> to vector<8x128xf32>
    %199 = math.tanh %198 : vector<8x128xf32>
    %200 = vector.extract_strided_slice %185 {offsets = [0, 384], sizes = [8, 128], strides = [1, 1]} : vector<8x512xf32> to vector<8x128xf32>
    %201 = arith.negf %200 : vector<8x128xf32>
    %202 = math.exp %201 : vector<8x128xf32>
    %cst_43 = arith.constant 1.000000e+00 : f32
    %203 = vector.broadcast %cst_43 : f32 to vector<8x128xf32>
    %204 = arith.addf %203, %202 : vector<8x128xf32>
    %205 = arith.divf %203, %204 : vector<8x128xf32>
    %206 = arith.mulf %197, %179 : vector<8x128xf32>
    %207 = arith.mulf %191, %199 : vector<8x128xf32>
    %208 = arith.addf %206, %207 : vector<8x128xf32>
    %209 = math.tanh %208 : vector<8x128xf32>
    %210 = arith.mulf %205, %209 : vector<8x128xf32>
    %c48 = arith.constant 48 : index
    %c0_44 = arith.constant 0 : index
    %211 = vector.load %arg9[%c48, %c0_44] : memref<64x128xf32, #tpu.memory_space<vmem>>, vector<8x128xf32>
    tpu.vector_store %arg9[%c48, %c0_44], %210 {strides = array<i32>} : memref<64x128xf32, #tpu.memory_space<vmem>>, vector<8x128xf32>,
    %212 = vector.extract_strided_slice %5 {offsets = [56, 0], sizes = [8, 512], strides = [1, 1]} : vector<64x512xf32> to vector<8x512xf32>
    %cst_45 = arith.constant dense<0.000000e+00> : vector<8x512xf32>
    %213 = tpu.matmul %210, %6, %cst_45 {dimension_numbers = #tpu.dot_dimension_numbers<[1], [0], [0], [1], [0, 0, 1, 1], [], []>} : vector<8x128xf32>, vector<128x512xf32>, vector<8x512xf32> -> vector<8x512xf32>
    %214 = arith.addf %212, %213 : vector<8x512xf32>
    %215 = vector.extract_strided_slice %214 {offsets = [0, 0], sizes = [8, 128], strides = [1, 1]} : vector<8x512xf32> to vector<8x128xf32>
    %216 = arith.negf %215 : vector<8x128xf32>
    %217 = math.exp %216 : vector<8x128xf32>
    %cst_46 = arith.constant 1.000000e+00 : f32
    %218 = vector.broadcast %cst_46 : f32 to vector<8x128xf32>
    %219 = arith.addf %218, %217 : vector<8x128xf32>
    %220 = arith.divf %218, %219 : vector<8x128xf32>
    %221 = vector.extract_strided_slice %214 {offsets = [0, 128], sizes = [8, 128], strides = [1, 1]} : vector<8x512xf32> to vector<8x128xf32>
    %222 = arith.negf %221 : vector<8x128xf32>
    %223 = math.exp %222 : vector<8x128xf32>
    %cst_47 = arith.constant 1.000000e+00 : f32
    %224 = vector.broadcast %cst_47 : f32 to vector<8x128xf32>
    %225 = arith.addf %224, %223 : vector<8x128xf32>
    %226 = arith.divf %224, %225 : vector<8x128xf32>
    %227 = vector.extract_strided_slice %214 {offsets = [0, 256], sizes = [8, 128], strides = [1, 1]} : vector<8x512xf32> to vector<8x128xf32>
    %228 = math.tanh %227 : vector<8x128xf32>
    %229 = vector.extract_strided_slice %214 {offsets = [0, 384], sizes = [8, 128], strides = [1, 1]} : vector<8x512xf32> to vector<8x128xf32>
    %230 = arith.negf %229 : vector<8x128xf32>
    %231 = math.exp %230 : vector<8x128xf32>
    %cst_48 = arith.constant 1.000000e+00 : f32
    %232 = vector.broadcast %cst_48 : f32 to vector<8x128xf32>
    %233 = arith.addf %232, %231 : vector<8x128xf32>
    %234 = arith.divf %232, %233 : vector<8x128xf32>
    %235 = arith.mulf %226, %208 : vector<8x128xf32>
    %236 = arith.mulf %220, %228 : vector<8x128xf32>
    %237 = arith.addf %235, %236 : vector<8x128xf32>
    %238 = math.tanh %237 : vector<8x128xf32>
    %239 = arith.mulf %234, %238 : vector<8x128xf32>
    %c56 = arith.constant 56 : index
    %c0_49 = arith.constant 0 : index
    %240 = vector.load %arg9[%c56, %c0_49] : memref<64x128xf32, #tpu.memory_space<vmem>>, vector<8x128xf32>
    tpu.vector_store %arg9[%c56, %c0_49], %239 {strides = array<i32>} : memref<64x128xf32, #tpu.memory_space<vmem>>, vector<8x128xf32>,
    %c0_50 = arith.constant 0 : index
    %c0_51 = arith.constant 0 : index
    %241 = vector.load %arg7[%c0_50, %c0_51] : memref<8x128xf32, #tpu.memory_space<vmem>>, vector<8x128xf32>
    tpu.vector_store %arg7[%c0_50, %c0_51], %239 {strides = array<i32>} : memref<8x128xf32, #tpu.memory_space<vmem>>, vector<8x128xf32>,
    %c0_52 = arith.constant 0 : index
    %c0_53 = arith.constant 0 : index
    %242 = vector.load %arg8[%c0_52, %c0_53] : memref<8x128xf32, #tpu.memory_space<vmem>>, vector<8x128xf32>
    tpu.vector_store %arg8[%c0_52, %c0_53], %237 {strides = array<i32>} : memref<8x128xf32, #tpu.memory_space<vmem>>, vector<8x128xf32>,
    %c0_54 = arith.constant 0 : index
    %c0_55 = arith.constant 0 : index
    %243 = vector.load %arg9[%c0_54, %c0_55] : memref<64x128xf32, #tpu.memory_space<vmem>>, vector<64x128xf32>
    %c0_56 = arith.constant 0 : index
    %c0_57 = arith.constant 0 : index
    %244 = vector.load %arg4[%c0_56, %c0_57] : memref<128x128xf32, #tpu.memory_space<vmem>>, vector<128x128xf32>
    %cst_58 = arith.constant dense<0.000000e+00> : vector<64x128xf32>
    %245 = tpu.matmul %243, %244, %cst_58 {dimension_numbers = #tpu.dot_dimension_numbers<[1], [0], [0], [1], [0, 0, 1, 1], [], []>} : vector<64x128xf32>, vector<128x128xf32>, vector<64x128xf32> -> vector<64x128xf32>
    %c0_59 = arith.constant 0 : index
    %c0_60 = arith.constant 0 : index
    %246 = vector.load %arg5[%c0_59, %c0_60] : memref<1x128xf32, #tpu.memory_space<vmem>>, vector<1x128xf32>
    %247 = vector.broadcast %246 : vector<1x128xf32> to vector<64x128xf32>
    %248 = arith.addf %245, %247 : vector<64x128xf32>
    %c0_61 = arith.constant 0 : index
    %c0_62 = arith.constant 0 : index
    %249 = vector.load %arg6[%c0_61, %c0_62] : memref<64x128xf32, #tpu.memory_space<vmem>>, vector<64x128xf32>
    tpu.vector_store %arg6[%c0_61, %c0_62], %248 {strides = array<i32>} : memref<64x128xf32, #tpu.memory_space<vmem>>, vector<64x128xf32>,
    return
  }
}

</mosaic_0001>

<bundles_post_ra>
// kernel: tpu_custom_call.1
= control target key start
LH: loop header
LB: loop body
LE: loop exit
PB: predicated region body
PF: predicated region fallthrough
CT: control target
= control target key end

     0   :  { %14 = vsyncpa [#allocation4], 0  ;;  %s3674_s0 = inlined_call_operand.vmem [shape: f32[64,32], index: 0, kind: input, shape index: {}]   ;;  %s3675_s1 = inlined_call_operand.hbm [shape: f32[32,512], index: 1, kind: input, shape index: {}]   ;;  %s3676_s2 = inlined_call_operand.hbm [shape: f32[128,512], index: 2, kind: input, shape index: {}]   ;;  %s3677_s3 = inlined_call_operand.vmem [shape: f32[1,512], index: 3, kind: input, shape index: {}]   ;;  %s3678_s4 = inlined_call_operand.hbm [shape: f32[128,128], index: 4, kind: input, shape index: {}]   ;;  %s3679_s5 = inlined_call_operand.vmem [shape: f32[1,128], index: 5, kind: input, shape index: {}]   ;;  %s3680_s6 = inlined_call_operand.hbm [shape: f32[64,128], index: 6, kind: output, shape index: {0}]   ;;  %s3681_s7 = inlined_call_operand.hbm [shape: f32[8,128], index: 7, kind: output, shape index: {1}]   ;;  %s3682_s8 = inlined_call_operand.hbm [shape: f32[8,128], index: 8, kind: output, shape index: {2}]  }
   0x1   :  { %15 = vsyncpa [#allocation7], 0 }
   0x2   :  { %16 = vsyncpa [#allocation5], 0 }
   0x3   :  { %17 = vsyncpa [#allocation11], 0  ;;  %s3001_s27 = smov [#allocation6]   ;;  %s3002_s29 = smov [#allocation3]  }
   0x4   :  { %s37_s28 = sshll.u32 %s3001_s27, 4  ;;  %s25_s30 = sshll.u32 %s3002_s29, 4  ;;  %s38_s28 = int_to_ptr.vmem [resolvable:$true] %s37_s28  ;;  %s3057_s30 = int_to_ptr.vmem [resolvable:$true] %s25_s30 }
   0x5   :  { %s2861_s11 = scalar_lea.hbm %s3676_s2, 8192 }
   0x6   :  { %p2862_p0 = scmp.ne.s32.totalorder %s3676_s2, %s2861_s11  ;;  %p2865_p1 = scmp.lt.u32.totalorder %s2861_s11, %s3676_s2 }
   0x8   :  { %p2867_p2 = pnand %p2865_p1, %p2862_p0 }
   0xa   :  { %2870 = shalt.err (!%p2867_p2)
}
   0xb   :  { %s2871_s16 = scalar_lea.vmem %s38_s28, 8192  ;;  %p2876_p4 = scmp.lt.s32.totalorder %s38_s28, %s38_s28 }
   0xc   :  { %p2872_p3 = scmp.ne.s32.totalorder %s38_s28, %s2871_s16  ;;  %p2877_p5 = scmp.lt.s32.totalorder %s2871_s16, %s2871_s16 }
   0xe   :  { %p2878_p6 = por %p2877_p5, %p2876_p4 }
  0x10   :  { %p2879_p7 = pnand %p2878_p6, %p2872_p3 }
  0x12   :  { %2882 = shalt.err (!%p2879_p7)
}
  0x13   :  { %s3003_s17 = smov 512   ;;  %s3004_s18 = smov 32  }
  0x14   :  { %43 = dma.hbm_to_vmem [thread:$0]  %s3676_s2, 8192, %s38_s28, [#allocation7], %s3003_s17, %s3003_s17, %s3004_s18  }
  0x15   :  { %s2883_s23 = scalar_lea.hbm %s3675_s1, 2048 }
  0x16   :  { %p2884_p8 = scmp.ne.s32.totalorder %s3675_s1, %s2883_s23  ;;  %p2887_p9 = scmp.lt.u32.totalorder %s2883_s23, %s3675_s1 }
  0x18   :  { %p2889_p10 = pnand %p2887_p9, %p2884_p8 }
  0x1a   :  { %2892 = shalt.err (!%p2889_p10)
}
  0x1b   :  { %s2893_s29 = scalar_lea.vmem %s3057_s30, 2048  ;;  %p2898_p12 = scmp.lt.s32.totalorder %s3057_s30, %s3057_s30 }
  0x1c   :  { %p2894_p11 = scmp.ne.s32.totalorder %s3057_s30, %s2893_s29  ;;  %p2899_p13 = scmp.lt.s32.totalorder %s2893_s29, %s2893_s29 }
  0x1e   :  { %p2900_p0 = por %p2899_p13, %p2898_p12 }
  0x20   :  { %p2901_p1 = pnand %p2900_p0, %p2894_p11 }
  0x22   :  { %2904 = shalt.err (!%p2901_p1)
}
  0x23   :  { %31 = dma.hbm_to_vmem [thread:$0]  %s3675_s1, 2048, %s3057_s30, [#allocation4], %s3003_s17, %s3003_s17, %s3004_s18  }
  0x24   :  { %s3005_s9 = smov [#allocation8]   ;;  %s2905_s13 = scalar_lea.hbm %s3678_s4, 2048 }
  0x25   :  { %s51_s10 = sshll.u32 %s3005_s9, 4  ;;  %p2906_p2 = scmp.ne.s32.totalorder %s3678_s4, %s2905_s13  ;;  %s52_s10 = int_to_ptr.vmem [resolvable:$true] %s51_s10 }
  0x26   :  { %p2909_p3 = scmp.lt.u32.totalorder %s2905_s13, %s3678_s4 }
  0x28   :  { %p2911_p4 = pnand %p2909_p3, %p2906_p2 }
  0x2a   :  { %2914 = shalt.err (!%p2911_p4)
}
  0x2b   :  { %s2915_s20 = scalar_lea.vmem %s52_s10, 2048  ;;  %p2920_p6 = scmp.lt.s32.totalorder %s52_s10, %s52_s10 }
  0x2c   :  { %p2916_p5 = scmp.ne.s32.totalorder %s52_s10, %s2915_s20  ;;  %p2921_p7 = scmp.lt.s32.totalorder %s2915_s20, %s2915_s20 }
  0x2e   :  { %p2922_p8 = por %p2921_p7, %p2920_p6 }
  0x30   :  { %p2923_p9 = pnand %p2922_p8, %p2916_p5 }
  0x32   :  { %2926 = shalt.err (!%p2923_p9)
}
  0x33   :  { %s3006_s1 = smov 128   ;;  %s3007_s30 = smov 8  }
  0x34   :  { %57 = dma.hbm_to_vmem [thread:$0]  %s3678_s4, 2048, %s52_s10, [#allocation7], %s3006_s1, %s3006_s1, %s3007_s30  }
  0x35   :  { %2993 = dma.done.wait [#allocation4], 2048  }
  0x36   :  { %2994 = vsyncadd [#allocation4], 4294965248 }
  0x37   :  { %2995 = dma.done.wait [#allocation7], 10240  }
  0x38   :  { %2996 = vsyncadd [#allocation7], 4294957056  ;;  %v3008_v0 = vmov 0.0   ;;  %v80_v1 = vld [vmem:[#allocation3 + $0x18] sm:$0xff]  ;;  %v79_v3 = vld [vmem:[#allocation3 + $0x10] sm:$0xff]  ;;  %vm115_vm0 = vcmask 261120  }
  0x39   :  { %317 = vmatprep.mubr.f32.mxu1 %v3008_v0  ;;  %204 = vmatprep.mubr.f32.mxu0 %v3008_v0  ;;  %v84_v2 = vld [vmem:[#allocation3 + $0x38] sm:$0xff]  ;;  %v83_v5 = vld [vmem:[#allocation3 + $0x30] sm:$0xff]  ;;  %v367_v12 = vld [vmem:[#allocation6 + $0x8] sm:$0xff] }
  0x3a   :  { %v2106_v4 = vpack.c.bf16 %v84_v2, %v80_v1  ;;  %v88_v6 = vld [vmem:[#allocation3 + $0x58] sm:$0xff]  ;;  %v2108_v8 = vpack.c.bf16 %v83_v5, %v79_v3  ;;  %v87_v10 = vld [vmem:[#allocation3 + $0x50] sm:$0xff]  ;;  %v371_v13 = vld [vmem:[#allocation6 + $0x28] sm:$0xff] }
  0x3b   :  { %v92_v7 = vld [vmem:[#allocation3 + $0x78] sm:$0xff]  ;;  %v91_v11 = vld [vmem:[#allocation3 + $0x70] sm:$0xff]  ;;  %v3105_v15 = vpack.c.bf16 %v371_v13, %v367_v12  ;;  %v366_v16 = vld [vmem:[#allocation6] sm:$0xff] }
  0x3c   :  { %v2110_v9 = vpack.c.bf16 %v92_v7, %v88_v6  ;;  %2107 = vmatprep.subr.bf16.mxu1 %v2106_v4  ;;  %v2112_v14 = vpack.c.bf16 %v91_v11, %v87_v10  ;;  %v370_v17 = vld [vmem:[#allocation6 + $0x20] sm:$0xff]  ;;  %v375_v18 = vld [vmem:[#allocation6 + $0x48] sm:$0xff]  ;;  %v3136_v40 = vld [vmem:[%s3674_s0 + $0x10] sm:$0xff] }
  0x3d   :  { %2109 = vmatpush1.bf16.msra.mxu1 %v2108_v8  ;;  %v379_v19 = vld [vmem:[#allocation6 + $0x68] sm:$0xff]  ;;  %v3110_v20 = vld [vmem:[%s3674_s0] sm:$0xff]  ;;  %v3112_v21 = vpack.c.bf16 %v370_v17, %v366_v16  ;;  %v3152_v53 = vld [vmem:[%s3674_s0 + $0x18] sm:$0xff] }
  0x3e   :  { %2111 = vmatprep.subr.bf16.mxu1 %v2110_v9  ;;  %v3115_v22 = vpack.c.bf16 %v379_v19, %v375_v18  ;;  %v374_v23 = vld [vmem:[#allocation6 + $0x40] sm:$0xff]  ;;  %v383_v25 = vld [vmem:[#allocation6 + $0x88] sm:$0xff]  ;;  %v75_v11 = vld [vmem:[%s3674_s0 + $0x30] sm:$0xff] }
  0x3f   :  { %v378_v24 = vld [vmem:[#allocation6 + $0x60] sm:$0xff]  ;;  %v387_v26 = vld [vmem:[#allocation6 + $0xa8] sm:$0xff]  ;;  %v369_v17 = vld [vmem:[#allocation6 + $0x18] sm:$0xff] }
  0x40   :  { %v3122_v27 = vld [vmem:[%s3674_s0 + $0x8] sm:$0xff]  ;;  %v3126_v28 = vpack.c.bf16 %v378_v24, %v374_v23  ;;  %v382_v29 = vld [vmem:[#allocation6 + $0x80] sm:$0xff]  ;;  %v3129_v32 = vpack.c.bf16 %v387_v26, %v383_v25  ;;  %v373_v18 = vld [vmem:[#allocation6 + $0x38] sm:$0xff] }
  0x41   :  { %2113 = vmatpush1.bf16.msra.mxu1 %v2112_v14  ;;  %v386_v30 = vld [vmem:[#allocation6 + $0xa0] sm:$0xff]  ;;  %v78_v31 = vld [vmem:[#allocation3 + $0x8] sm:$0xff]  ;;  %v76_v19 = vld [vmem:[%s3674_s0 + $0x38] sm:$0xff]  ;;  %v3224_v23 = vpack.c.bf16 %v373_v18, %v369_v17 }
  0x42   :  { %2115 = vmatprep.subr.bf16.mxu1 %v3105_v15  ;;  %v82_v33 = vld [vmem:[#allocation3 + $0x28] sm:$0xff]  ;;  %v77_v34 = vld [vmem:[#allocation3] sm:$0xff]  ;;  %v3140_v42 = vpack.c.bf16 %v386_v30, %v382_v29  ;;  %v368_v24 = vld [vmem:[#allocation6 + $0x10] sm:$0xff] }
  0x43   :  { %v81_v35 = vld [vmem:[#allocation3 + $0x20] sm:$0xff]  ;;  %v391_v36 = vld [vmem:[#allocation6 + $0xc8] sm:$0xff]  ;;  %v2098_v38 = vpack.c.bf16 %v82_v33, %v78_v31  ;;  %v372_v25 = vld [vmem:[#allocation6 + $0x30] sm:$0xff] }
  0x44   :  { %1997 = vmatmul.mubr.msk.f32.vlgmr.msra.gmra.mrb[0].mxu1 %vm115_vm0, %v3110_v20  ;;  %v395_v37 = vld [vmem:[#allocation6 + $0xe8] sm:$0xff]  ;;  %v2100_v39 = vpack.c.bf16 %v81_v35, %v77_v34  ;;  %v85_v44 = vld [vmem:[#allocation3 + $0x40] sm:$0xff]  ;;  %v377_v26 = vld [vmem:[#allocation6 + $0x58] sm:$0xff]  ;;  %v3234_v29 = vpack.c.bf16 %v372_v25, %v368_v24 }
  0x45   :  { %2117 = vmatpush1.bf16.msra.mxu1 %v3112_v21  ;;  %323 = vmatprep.mubr.f32.mxu1 %v3008_v0  ;;  %v86_v41 = vld [vmem:[#allocation3 + $0x48] sm:$0xff]  ;;  %v89_v45 = vld [vmem:[#allocation3 + $0x60] sm:$0xff]  ;;  %v3143_v46 = vpack.c.bf16 %v395_v37, %v391_v36  ;;  %v376_v31 = vld [vmem:[#allocation6 + $0x50] sm:$0xff] }
  0x46   :  { %2119 = vmatprep.subr.bf16.mxu1 %v3115_v22  ;;  %v90_v43 = vld [vmem:[#allocation3 + $0x68] sm:$0xff]  ;;  %v390_v47 = vld [vmem:[#allocation6 + $0xc0] sm:$0xff]  ;;  %2099 = vmatprep.subr.bf16.mxu0 %v2098_v38  ;;  %v2104_v52 = vpack.c.bf16 %v89_v45, %v85_v44  ;;  %v380_v33 = vld [vmem:[#allocation6 + $0x70] sm:$0xff] }
  0x47   :  { %v394_v48 = vld [vmem:[#allocation6 + $0xe0] sm:$0xff]  ;;  %v2102_v49 = vpack.c.bf16 %v90_v43, %v86_v41  ;;  %v399_v50 = vld [vmem:[#allocation6 + $0x108] sm:$0xff]  ;;  %2101 = vmatpush1.bf16.msra.mxu0 %v2100_v39  ;;  %v385_v34 = vld [vmem:[#allocation6 + $0x98] sm:$0xff]  ;;  %v3246_v36 = vpack.c.bf16 %v380_v33, %v376_v31 }
  0x48   :  { %1998 = vmatmul.mubr.msk.f32.gmra.mrb[2].mxu1 %vm115_vm0, %v3122_v27  ;;  %v403_v51 = vld [vmem:[#allocation6 + $0x128] sm:$0xff]  ;;  %v3154_v54 = vpack.c.bf16 %v394_v48, %v390_v47  ;;  %v398_v56 = vld [vmem:[#allocation6 + $0x100] sm:$0xff]  ;;  %v389_v35 = vld [vmem:[#allocation6 + $0xb8] sm:$0xff] }
  0x49   :  { %2121 = vmatpush1.bf16.msra.mxu1 %v3126_v28  ;;  %329 = vmatprep.mubr.f32.mxu1 %v3008_v0  ;;  %v3157_v55 = vpack.c.bf16 %v403_v51, %v399_v50  ;;  %v402_v57 = vld [vmem:[#allocation6 + $0x120] sm:$0xff]  ;;  %v407_v58 = vld [vmem:[#allocation6 + $0x148] sm:$0xff]  ;;  %v3250_v37 = vpack.c.bf16 %v389_v35, %v385_v34  ;;  %v384_v38 = vld [vmem:[#allocation6 + $0x90] sm:$0xff] }
  0x4a   :  { %2123 = vmatprep.subr.bf16.mxu1 %v3129_v32  ;;  %2103 = vmatprep.subr.bf16.mxu0 %v2102_v49  ;;  %v411_v59 = vld [vmem:[#allocation6 + $0x168] sm:$0xff]  ;;  %v3167_v60 = vld [vmem:[%s3674_s0 + $0x20] sm:$0xff]  ;;  %v3169_v61 = vpack.c.bf16 %v402_v57, %v398_v56  ;;  %v388_v39 = vld [vmem:[#allocation6 + $0xb0] sm:$0xff] }
  0x4b   :  { %2105 = vmatpush1.bf16.msra.mxu0 %v2104_v52  ;;  %v3172_v62 = vpack.c.bf16 %v411_v59, %v407_v58  ;;  %v406_v63 = vld [vmem:[#allocation6 + $0x140] sm:$0xff]  ;;  %v415_v2 = vld [vmem:[#allocation6 + $0x188] sm:$0xff]  ;;  %v397_v41 = vld [vmem:[#allocation6 + $0xf8] sm:$0xff]  ;;  %v3258_v43 = vpack.c.bf16 %v388_v39, %v384_v38 }
  0x4c   :  { %1999 = vmatmul.mubr.msk.f32.gmra.mrb[4].mxu1 %vm115_vm0, %v3136_v40  ;;  %2179 = vmatprep.subr.bf16.mxu0 %v3105_v15  ;;  %v410_v1 = vld [vmem:[#allocation6 + $0x160] sm:$0xff]  ;;  %v419_v3 = vld [vmem:[#allocation6 + $0x1a8] sm:$0xff]  ;;  %v392_v45 = vld [vmem:[#allocation6 + $0xd0] sm:$0xff] }
  0x4d   :  { %2125 = vmatpush1.bf16.msra.mxu1 %v3140_v42  ;;  %335 = vmatprep.mubr.f32.mxu1 %v3008_v0  ;;  %v3186_v4 = vld [vmem:[%s3674_s0 + $0x28] sm:$0xff]  ;;  %v3188_v5 = vpack.c.bf16 %v410_v1, %v406_v63  ;;  %v3191_v6 = vpack.c.bf16 %v419_v3, %v415_v2  ;;  %v414_v7 = vld [vmem:[#allocation6 + $0x180] sm:$0xff]  ;;  %v396_v47 = vld [vmem:[#allocation6 + $0xf0] sm:$0xff] }
  0x4e   :  { %2127 = vmatprep.subr.bf16.mxu1 %v3143_v46  ;;  %1989 = vmatmul.mubr.msk.f32.vlgmr.msra.gmra.mrb[0].mxu0 %vm115_vm0, %v3110_v20  ;;  %v418_v8 = vld [vmem:[#allocation6 + $0x1a0] sm:$0xff]  ;;  %v423_v9 = vld [vmem:[#allocation6 + $0x1c8] sm:$0xff]  ;;  %v401_v48 = vld [vmem:[#allocation6 + $0x118] sm:$0xff]  ;;  %v3268_v50 = vpack.c.bf16 %v396_v47, %v392_v45 }
  0x4f   :  { %2181 = vmatpush1.bf16.msra.mxu0 %v3112_v21  ;;  %210 = vmatprep.mubr.f32.mxu0 %v3008_v0  ;;  %v427_v10 = vld [vmem:[#allocation6 + $0x1e8] sm:$0xff]  ;;  %v3205_v12 = vpack.c.bf16 %v418_v8, %v414_v7  ;;  %v422_v14 = vld [vmem:[#allocation6 + $0x1c0] sm:$0xff]  ;;  %v405_v49 = vld [vmem:[#allocation6 + $0x138] sm:$0xff] }
  0x50   :  { %2000 = vmatmul.mubr.msk.f32.gmra.mrb[6].mxu1 %vm115_vm0, %v3152_v53  ;;  %2183 = vmatprep.subr.bf16.mxu0 %v3115_v22  ;;  %v3208_v13 = vpack.c.bf16 %v427_v10, %v423_v9  ;;  %v426_v16 = vld [vmem:[#allocation6 + $0x1e0] sm:$0xff]  ;;  %v3271_v51 = vpack.c.bf16 %v405_v49, %v401_v48  ;;  %v400_v52 = vld [vmem:[#allocation6 + $0x110] sm:$0xff]  ;;  %v409_v56 = vld [vmem:[#allocation6 + $0x158] sm:$0xff] }
  0x51   :  { %2129 = vmatpush1.bf16.msra.mxu1 %v3154_v54  ;;  %341 = vmatprep.mubr.f32.mxu1 %v3008_v0  ;;  %v3221_v20 = vpack.c.bf16 %v426_v16, %v422_v14  ;;  %v413_v57 = vld [vmem:[#allocation6 + $0x178] sm:$0xff]  ;;  %v412_v63 = vld [vmem:[#allocation6 + $0x170] sm:$0xff]  ;;  %v93_v31 = vld [vmem:[%s3677_s3] sm:$0xf] }
  0x52   :  { %2131 = vmatprep.subr.bf16.mxu1 %v3157_v55  ;;  %1990 = vmatmul.mubr.msk.f32.gmra.mrb[2].mxu0 %vm115_vm0, %v3122_v27  ;;  %v381_v27 = vld [vmem:[#allocation6 + $0x78] sm:$0xff]  ;;  %v3281_v59 = vpack.c.bf16 %v413_v57, %v409_v56  ;;  %v416_v7 = vld [vmem:[#allocation6 + $0x190] sm:$0xff] }
  0x53   :  { %2185 = vmatpush1.bf16.msra.mxu0 %v3126_v28  ;;  %216 = vmatprep.mubr.f32.mxu0 %v3008_v0  ;;  %v3237_v30 = vpack.c.bf16 %v381_v27, %v377_v26  ;;  %v417_v1 = vld [vmem:[#allocation6 + $0x198] sm:$0xff]  ;;  %v420_v8 = vld [vmem:[#allocation6 + $0x1b0] sm:$0xff] }
  0x54   :  { %2001 = vmatmul.mubr.msk.f32.gmra.mrb[8].mxu1 %vm115_vm0, %v3167_v60  ;;  %2187 = vmatprep.subr.bf16.mxu0 %v3129_v32  ;;  %v421_v2 = vld [vmem:[#allocation6 + $0x1b8] sm:$0xff]  ;;  %v424_v16 = vld [vmem:[#allocation6 + $0x1d0] sm:$0xff] }
  0x55   :  { %2133 = vmatpush1.bf16.msra.mxu1 %v3169_v61  ;;  %347 = vmatprep.mubr.f32.mxu1 %v3008_v0  ;;  %v425_v9 = vld [vmem:[#allocation6 + $0x1d8] sm:$0xff]  ;;  %v428_v17 = vld [vmem:[#allocation6 + $0x1f0] sm:$0xff] }
  0x56   :  { %2135 = vmatprep.subr.bf16.mxu1 %v3172_v62  ;;  %1991 = vmatmul.mubr.msk.f32.gmra.mrb[4].mxu0 %vm115_vm0, %v3136_v40  ;;  %v393_v40 = vld [vmem:[#allocation6 + $0xd8] sm:$0xff]  ;;  %v3296_v18 = vpack.c.bf16 %v428_v17, %v424_v16 }
  0x57   :  { %2189 = vmatpush1.bf16.msra.mxu0 %v3140_v42  ;;  %222 = vmatprep.mubr.f32.mxu0 %v3008_v0  ;;  %v3261_v44 = vpack.c.bf16 %v397_v41, %v393_v40  ;;  %v429_v10 = vld [vmem:[#allocation6 + $0x1f8] sm:$0xff] }
  0x58   :  { %2002 = vmatmul.mubr.msk.f32.gmra.mrb[10].mxu1 %vm115_vm0, %v3186_v4  ;;  %2191 = vmatprep.subr.bf16.mxu0 %v3143_v46  ;;  %v3293_v14 = vpack.c.bf16 %v429_v10, %v425_v9 }
  0x59   :  { %2137 = vmatpush1.bf16.msra.mxu1 %v3188_v5  ;;  %353 = vmatprep.mubr.f32.mxu1 %v3008_v0 }
  0x5a   :  { %2139 = vmatprep.subr.bf16.mxu1 %v3191_v6  ;;  %1992 = vmatmul.mubr.msk.f32.gmra.mrb[6].mxu0 %vm115_vm0, %v3152_v53  ;;  %v404_v53 = vld [vmem:[#allocation6 + $0x130] sm:$0xff] }
  0x5b   :  { %2193 = vmatpush1.bf16.msra.mxu0 %v3154_v54  ;;  %228 = vmatprep.mubr.f32.mxu0 %v3008_v0  ;;  %v3278_v58 = vpack.c.bf16 %v404_v53, %v400_v52 }
  0x5c   :  { %2003 = vmatmul.mubr.msk.f32.gmra.mrb[12].mxu1 %vm115_vm0, %v75_v11  ;;  %2195 = vmatprep.subr.bf16.mxu0 %v3157_v55 }
  0x5d   :  { %2141 = vmatpush1.bf16.msra.mxu1 %v3205_v12  ;;  %359 = vmatprep.mubr.f32.mxu1 %v3008_v0 }
  0x5e   :  { %2143 = vmatprep.subr.bf16.mxu1 %v3208_v13  ;;  %1993 = vmatmul.mubr.msk.f32.gmra.mrb[8].mxu0 %vm115_vm0, %v3167_v60  ;;  %v408_v60 = vld [vmem:[#allocation6 + $0x150] sm:$0xff] }
  0x5f   :  { %2197 = vmatpush1.bf16.msra.mxu0 %v3169_v61  ;;  %234 = vmatprep.mubr.f32.mxu0 %v3008_v0  ;;  %v3284_v3 = vpack.c.bf16 %v412_v63, %v408_v60 }
  0x60   :  { %2004 = vmatmul.mubr.msk.f32.gmra.mrb[14].mxu1 %vm115_vm0, %v76_v19  ;;  %2199 = vmatprep.subr.bf16.mxu0 %v3172_v62 }
  0x61   :  { %2145 = vmatpush1.bf16.msra.mxu1 %v3221_v20  ;;  %494 = vmatprep.mubr.f32.mxu1 %v3008_v0 }
  0x62   :  { %2147 = vmatprep.subr.bf16.mxu1 %v3224_v23  ;;  %1994 = vmatmul.mubr.msk.f32.gmra.mrb[10].mxu0 %vm115_vm0, %v3186_v4  ;;  %v3287_v4 = vpack.c.bf16 %v421_v2, %v417_v1 }
  0x63   :  { %2201 = vmatpush1.bf16.msra.mxu0 %v3188_v5  ;;  %240 = vmatprep.mubr.f32.mxu0 %v3008_v0 }
  0x64   :  { %495 = vmatmul.mubr.f32.vlgmr.msra.gmra.mrb[16].mxu1 %v3008_v0  ;;  %2203 = vmatprep.subr.bf16.mxu0 %v3191_v6 }
  0x65   :  { %2149 = vmatpush1.bf16.msra.mxu1 %v3234_v29  ;;  %565 = vmatprep.mubr.f32.mxu1 %v3008_v0 }
  0x66   :  { %2151 = vmatprep.subr.bf16.mxu1 %v3237_v30  ;;  %1995 = vmatmul.mubr.msk.f32.gmra.mrb[12].mxu0 %vm115_vm0, %v75_v11  ;;  %v3290_v11 = vpack.c.bf16 %v420_v8, %v416_v7 }
  0x67   :  { %2205 = vmatpush1.bf16.msra.mxu0 %v3205_v12  ;;  %246 = vmatprep.mubr.f32.mxu0 %v3008_v0 }
  0x68   :  { %2207 = vmatprep.subr.bf16.mxu0 %v3208_v13 }
  0x69   :  { %2153 = vmatpush1.bf16.msra.mxu1 %v3246_v36 }
  0x6a   :  { %2155 = vmatprep.subr.bf16.mxu1 %v3250_v37  ;;  %1996 = vmatmul.mubr.msk.f32.gmra.mrb[14].mxu0 %vm115_vm0, %v76_v19  ;;  %v95_v19 = vlaneseq }
  0x6b   :  { %2209 = vmatpush1.bf16.msra.mxu0 %v3221_v20  ;;  %665 = vmatprep.mubr.f32.mxu0 %v3008_v0 }
  0x6c   :  { %2243 = vmatprep.subr.bf16.mxu0 %v3105_v15  ;;  %v96_v26 = vshrl.u32 %v95_v19, 7 }
  0x6d   :  { %2157 = vmatpush1.bf16.msra.mxu1 %v3258_v43 }
  0x6e   :  { %2159 = vmatprep.subr.bf16.mxu1 %v3261_v44  ;;  %v97_v27 = vsub.s32 0, %v96_v26  ;;  %v101_v33 = vsub.s32 1, %v96_v26  ;;  %v105_v52 = vsub.s32 2, %v96_v26  ;;  %v109_v56 = vsub.s32 3, %v96_v26 }
  0x70   :  { %v3322_v34 = vrot.slane %v93_v31, %v97_v27  ;;  %v3324_v35 = vrot.slane %v93_v31, %v101_v33  ;;  %v3328_v63 = vrot.slane %v93_v31, %v105_v52  ;;  %v3330_v2 = vrot.slane %v93_v31, %v109_v56 }
  0x71   :  { %2161 = vmatpush1.bf16.msra.mxu1 %v3268_v50 }
  0x72   :  { %2163 = vmatprep.subr.bf16.mxu1 %v3271_v51 }
  0x75   :  { %2165 = vmatpush1.bf16.msra.mxu1 %v3278_v58 }
  0x76   :  { %2167 = vmatprep.subr.bf16.mxu1 %v3281_v59 }
  0x79   :  { %2169 = vmatpush1.bf16.msra.mxu1 %v3284_v3 }
  0x7a   :  { %2171 = vmatprep.subr.bf16.mxu1 %v3287_v4 }
  0x7d   :  { %2173 = vmatpush1.bf16.msra.mxu1 %v3290_v11 }
  0x7e   :  { %2175 = vmatprep.subr.bf16.mxu1 %v3293_v14 }
  0x81   :  { %2177 = vmatpush1.bf16.msra.mxu1 %v3296_v18 }
  0x82   :  { %2211 = vmatprep.subr.bf16.mxu1 %v3224_v23 }
  0x84   :  { %566 = vmatmul.mubr.f32.vlgmr.msra.gmra.mrb[0].mxu1 %v3008_v0 }
  0x85   :  { %2213 = vmatpush1.bf16.msra.mxu1 %v3234_v29  ;;  %736 = vmatprep.mubr.f32.mxu1 %v3008_v0 }
  0x86   :  { %2215 = vmatprep.subr.bf16.mxu1 %v3237_v30 }
  0x89   :  { %2217 = vmatpush1.bf16.msra.mxu1 %v3246_v36 }
  0x8a   :  { %2219 = vmatprep.subr.bf16.mxu1 %v3250_v37 }
  0x8d   :  { %2221 = vmatpush1.bf16.msra.mxu1 %v3258_v43 }
  0x8e   :  { %2223 = vmatprep.subr.bf16.mxu1 %v3261_v44 }
  0x91   :  { %2225 = vmatpush1.bf16.msra.mxu1 %v3268_v50 }
  0x92   :  { %2227 = vmatprep.subr.bf16.mxu1 %v3271_v51 }
  0x95   :  { %2229 = vmatpush1.bf16.msra.mxu1 %v3278_v58 }
  0x96   :  { %2231 = vmatprep.subr.bf16.mxu1 %v3281_v59 }
  0x99   :  { %2233 = vmatpush1.bf16.msra.mxu1 %v3284_v3 }
  0x9a   :  { %2235 = vmatprep.subr.bf16.mxu1 %v3287_v4 }
  0x9d   :  { %2237 = vmatpush1.bf16.msra.mxu1 %v3290_v11 }
  0x9e   :  { %2239 = vmatprep.subr.bf16.mxu1 %v3293_v14 }
  0xa1   :  { %2241 = vmatpush1.bf16.msra.mxu1 %v3296_v18 }
  0xa2   :  { %2275 = vmatprep.subr.bf16.mxu1 %v3224_v23 }
 0x121   :  { %v206_v24 = vpop.f32.mrb[0].mxu0 }
 0x122   :  { %v208_v25 = vpop.f32.mrb[1].mxu0  ;;  %v207_v38 = vadd.f32 %v206_v24, %v3322_v34 }
 0x123   :  { %v209_v39 = vadd.f32 %v208_v25, %v3324_v35 }
 0x137   :  { %v496_v40 = vpop.f32.mrb[16].mxu1 }
 0x138   :  { %v572_v41 = vadd.f32 %v496_v40, %v207_v38  ;;  %v498_v45 = vpop.f32.mrb[17].mxu1 }
 0x139   :  { %v573_v47 = vadd.f32 %v498_v45, %v209_v39 }
 0x13a   :  { %v2005_v49 = vmul.f32 -1.442695, %v572_v41 }
 0x13b   :  { %v2006_v48 = vmul.f32 -1.442695, %v573_v47 }
 0x13d   :  { %2733 = vpow2.f32 %v2006_v48 }
 0x13e   :  { %2735 = vpow2.f32 %v2005_v49 }
 0x147   :  { %v2734_v53 = vpop.eup %2733 }
 0x148   :  { %v2736_v57 = vpop.eup %2735  ;;  %v585_v60 = vadd.f32 1.0, %v2734_v53 }
 0x149   :  { %v579_v1 = vadd.f32 1.0, %v2736_v57 }
 0x14a   :  { %2737 = vrcp.f32 %v585_v60 }
 0x14b   :  { %2739 = vrcp.f32 %v579_v1 }
 0x154   :  { %v2738_v17 = vpop.eup %2737 }
 0x155   :  { %v2740_v19 = vpop.eup %2739  ;;  %v595_v25 = vmul.f32 0.0, %v2738_v17 }
 0x157   :  { %v567_v7 = vpop.f32.mrb[0].mxu1 }
 0x158   :  { %v2676_v8 = vadd.f32 %v567_v7, %v3328_v63  ;;  %v569_v9 = vpop.f32.mrb[1].mxu1 }
 0x159   :  { %v2677_v10 = vadd.f32 %v569_v9, %v3330_v2 }
 0x15a   :  { %2741 = vtanh.f32 %v2676_v8 }
 0x15b   :  { %v2007_v16 = vmul.f32 -1.442695, %v2677_v10 }
 0x15d   :  { %2743 = vpow2.f32 %v2007_v16 }
 0x164   :  { %v2742_v24 = vpop.eup %2741 }
 0x165   :  { %v596_v26 = vmul.f32 %v2742_v24, %v2740_v19 }
 0x167   :  { %v2744_v27 = vpop.eup %2743  ;;  %v3334_v33 = vadd.f32 %v596_v26, %v595_v25 }
 0x168   :  { %v592_v31 = vadd.f32 1.0, %v2744_v27 }
 0x169   :  { %2745 = vtanh.f32 %v3334_v33 }
 0x16a   :  { %2747 = vrcp.f32 %v592_v31 }
 0x173   :  { %v2746_v38 = vpop.eup %2745 }
 0x174   :  { %v2748_v39 = vpop.eup %2747 }
 0x175   :  { %v3337_v40 = vmul.f32 %v2748_v39, %v2746_v38 }
 0x177   :  { %666 = vmatmul.mubr.f32.vlgmr.msra.gmra.mrb[2].mxu0 %v3337_v40  ;;  %737 = vmatmul.mubr.f32.vlgmr.msra.gmra.mrb[2].mxu1 %v3337_v40 }
 0x178   :  { %2245 = vmatpush1.bf16.msra.mxu0 %v3112_v21  ;;  %2277 = vmatpush1.bf16.msra.mxu1 %v3234_v29 }
 0x179   :  { %2247 = vmatprep.subr.bf16.mxu0 %v3115_v22  ;;  %2279 = vmatprep.subr.bf16.mxu1 %v3237_v30 }
 0x17a   :  { %836 = vmatprep.mubr.f32.mxu0 %v3008_v0  ;;  %907 = vmatprep.mubr.f32.mxu1 %v3008_v0 }
 0x17c   :  { %2249 = vmatpush1.bf16.msra.mxu0 %v3126_v28  ;;  %2281 = vmatpush1.bf16.msra.mxu1 %v3246_v36 }
 0x17d   :  { %2251 = vmatprep.subr.bf16.mxu0 %v3129_v32  ;;  %2283 = vmatprep.subr.bf16.mxu1 %v3250_v37 }
 0x180   :  { %2253 = vmatpush1.bf16.msra.mxu0 %v3140_v42  ;;  %2285 = vmatpush1.bf16.msra.mxu1 %v3258_v43 }
 0x181   :  { %2255 = vmatprep.subr.bf16.mxu0 %v3143_v46  ;;  %2287 = vmatprep.subr.bf16.mxu1 %v3261_v44 }
 0x184   :  { %2257 = vmatpush1.bf16.msra.mxu0 %v3154_v54  ;;  %2289 = vmatpush1.bf16.msra.mxu1 %v3268_v50 }
 0x185   :  { %2259 = vmatprep.subr.bf16.mxu0 %v3157_v55  ;;  %2291 = vmatprep.subr.bf16.mxu1 %v3271_v51 }
 0x188   :  { %2261 = vmatpush1.bf16.msra.mxu0 %v3169_v61  ;;  %2293 = vmatpush1.bf16.msra.mxu1 %v3278_v58 }
 0x189   :  { %2263 = vmatprep.subr.bf16.mxu0 %v3172_v62  ;;  %2295 = vmatprep.subr.bf16.mxu1 %v3281_v59 }
 0x18c   :  { %2265 = vmatpush1.bf16.msra.mxu0 %v3188_v5  ;;  %2297 = vmatpush1.bf16.msra.mxu1 %v3284_v3 }
 0x18d   :  { %2267 = vmatprep.subr.bf16.mxu0 %v3191_v6  ;;  %2299 = vmatprep.subr.bf16.mxu1 %v3287_v4 }
 0x190   :  { %2269 = vmatpush1.bf16.msra.mxu0 %v3205_v12  ;;  %2301 = vmatpush1.bf16.msra.mxu1 %v3290_v11 }
 0x191   :  { %2271 = vmatprep.subr.bf16.mxu0 %v3208_v13  ;;  %2303 = vmatprep.subr.bf16.mxu1 %v3293_v14 }
 0x194   :  { %2273 = vmatpush1.bf16.msra.mxu0 %v3221_v20  ;;  %2305 = vmatpush1.bf16.msra.mxu1 %v3296_v18 }
 0x195   :  { %2307 = vmatprep.subr.bf16.mxu0 %v3105_v15  ;;  %2339 = vmatprep.subr.bf16.mxu1 %v3224_v23 }
 0x24a   :  { %v667_v41 = vpop.f32.mrb[2].mxu0  ;;  %v738_v45 = vpop.f32.mrb[2].mxu1 }
 0x24b   :  { %v2662_v47 = vadd.f32 %v667_v41, %v3322_v34  ;;  %v669_v48 = vpop.f32.mrb[3].mxu0  ;;  %v740_v49 = vpop.f32.mrb[3].mxu1  ;;  %v2678_v1 = vadd.f32 %v738_v45, %v3328_v63 }
 0x24c   :  { %v2663_v52 = vadd.f32 %v669_v48, %v3324_v35  ;;  %v2679_v57 = vadd.f32 %v740_v49, %v3330_v2 }
 0x24d   :  { %v2008_v53 = vmul.f32 -1.442695, %v2662_v47 }
 0x24e   :  { %v2009_v56 = vmul.f32 -1.442695, %v2663_v52  ;;  %v2010_v60 = vmul.f32 -1.442695, %v2679_v57 }
 0x24f   :  { %2749 = vpow2.f32 %v2008_v53 }
 0x250   :  { %2751 = vpow2.f32 %v2009_v56 }
 0x251   :  { %2753 = vpow2.f32 %v2010_v60 }
 0x252   :  { %2755 = vtanh.f32 %v2678_v1 }
 0x259   :  { %v2750_v7 = vpop.eup %2749 }
 0x25a   :  { %v2752_v8 = vpop.eup %2751  ;;  %v750_v9 = vadd.f32 1.0, %v2750_v7 }
 0x25b   :  { %v756_v10 = vadd.f32 1.0, %v2752_v8  ;;  %v2754_v16 = vpop.eup %2753 }
 0x25c   :  { %2757 = vrcp.f32 %v750_v9  ;;  %v2756_v17 = vpop.eup %2755  ;;  %v763_v26 = vadd.f32 1.0, %v2754_v16 }
 0x25d   :  { %2759 = vrcp.f32 %v756_v10 }
 0x25e   :  { %2761 = vrcp.f32 %v763_v26 }
 0x266   :  { %v2758_v19 = vpop.eup %2757 }
 0x267   :  { %v2760_v24 = vpop.eup %2759  ;;  %v767_v25 = vmul.f32 %v2758_v19, %v2756_v17 }
 0x268   :  { %v766_v27 = vmul.f32 %v2760_v24, %v3334_v33  ;;  %v2762_v38 = vpop.eup %2761 }
 0x26a   :  { %v3380_v31 = vadd.f32 %v767_v25, %v766_v27 }
 0x26c   :  { %2763 = vtanh.f32 %v3380_v31 }
 0x276   :  { %v2764_v39 = vpop.eup %2763 }
 0x277   :  { %v3383_v41 = vmul.f32 %v2764_v39, %v2762_v38 }
 0x279   :  { %837 = vmatmul.mubr.f32.vlgmr.msra.gmra.mrb[4].mxu0 %v3383_v41  ;;  %908 = vmatmul.mubr.f32.vlgmr.msra.gmra.mrb[4].mxu1 %v3383_v41 }
 0x27a   :  { %2309 = vmatpush1.bf16.msra.mxu0 %v3112_v21  ;;  %2341 = vmatpush1.bf16.msra.mxu1 %v3234_v29 }
 0x27b   :  { %2311 = vmatprep.subr.bf16.mxu0 %v3115_v22  ;;  %2343 = vmatprep.subr.bf16.mxu1 %v3237_v30 }
 0x27c   :  { %1007 = vmatprep.mubr.f32.mxu0 %v3008_v0  ;;  %1078 = vmatprep.mubr.f32.mxu1 %v3008_v0 }
 0x27e   :  { %2313 = vmatpush1.bf16.msra.mxu0 %v3126_v28  ;;  %2345 = vmatpush1.bf16.msra.mxu1 %v3246_v36 }
 0x27f   :  { %2315 = vmatprep.subr.bf16.mxu0 %v3129_v32  ;;  %2347 = vmatprep.subr.bf16.mxu1 %v3250_v37 }
 0x282   :  { %2317 = vmatpush1.bf16.msra.mxu0 %v3140_v42  ;;  %2349 = vmatpush1.bf16.msra.mxu1 %v3258_v43 }
 0x283   :  { %2319 = vmatprep.subr.bf16.mxu0 %v3143_v46  ;;  %2351 = vmatprep.subr.bf16.mxu1 %v3261_v44 }
 0x286   :  { %2321 = vmatpush1.bf16.msra.mxu0 %v3154_v54  ;;  %2353 = vmatpush1.bf16.msra.mxu1 %v3268_v50 }
 0x287   :  { %2323 = vmatprep.subr.bf16.mxu0 %v3157_v55  ;;  %2355 = vmatprep.subr.bf16.mxu1 %v3271_v51 }
 0x28a   :  { %2325 = vmatpush1.bf16.msra.mxu0 %v3169_v61  ;;  %2357 = vmatpush1.bf16.msra.mxu1 %v3278_v58 }
 0x28b   :  { %2327 = vmatprep.subr.bf16.mxu0 %v3172_v62  ;;  %2359 = vmatprep.subr.bf16.mxu1 %v3281_v59 }
 0x28e   :  { %2329 = vmatpush1.bf16.msra.mxu0 %v3188_v5  ;;  %2361 = vmatpush1.bf16.msra.mxu1 %v3284_v3 }
 0x28f   :  { %2331 = vmatprep.subr.bf16.mxu0 %v3191_v6  ;;  %2363 = vmatprep.subr.bf16.mxu1 %v3287_v4 }
 0x292   :  { %2333 = vmatpush1.bf16.msra.mxu0 %v3205_v12  ;;  %2365 = vmatpush1.bf16.msra.mxu1 %v3290_v11 }
 0x293   :  { %2335 = vmatprep.subr.bf16.mxu0 %v3208_v13  ;;  %2367 = vmatprep.subr.bf16.mxu1 %v3293_v14 }
 0x296   :  { %2337 = vmatpush1.bf16.msra.mxu0 %v3221_v20  ;;  %2369 = vmatpush1.bf16.msra.mxu1 %v3296_v18 }
 0x297   :  { %2371 = vmatprep.subr.bf16.mxu0 %v3105_v15  ;;  %2403 = vmatprep.subr.bf16.mxu1 %v3224_v23 }
 0x34c   :  { %v838_v33 = vpop.f32.mrb[4].mxu0  ;;  %v909_v45 = vpop.f32.mrb[4].mxu1 }
 0x34d   :  { %v2664_v47 = vadd.f32 %v838_v33, %v3322_v34  ;;  %v840_v48 = vpop.f32.mrb[5].mxu0  ;;  %v911_v49 = vpop.f32.mrb[5].mxu1  ;;  %v2680_v1 = vadd.f32 %v909_v45, %v3328_v63 }
 0x34e   :  { %v2665_v52 = vadd.f32 %v840_v48, %v3324_v35  ;;  %v2681_v57 = vadd.f32 %v911_v49, %v3330_v2 }
 0x34f   :  { %v2011_v53 = vmul.f32 -1.442695, %v2664_v47 }
 0x350   :  { %v2012_v56 = vmul.f32 -1.442695, %v2665_v52  ;;  %v2013_v60 = vmul.f32 -1.442695, %v2681_v57 }
 0x351   :  { %2765 = vpow2.f32 %v2011_v53 }
 0x352   :  { %2767 = vpow2.f32 %v2012_v56 }
 0x353   :  { %2769 = vpow2.f32 %v2013_v60 }
 0x354   :  { %2771 = vtanh.f32 %v2680_v1 }
 0x35b   :  { %v2766_v7 = vpop.eup %2765 }
 0x35c   :  { %v2768_v8 = vpop.eup %2767  ;;  %v921_v9 = vadd.f32 1.0, %v2766_v7 }
 0x35d   :  { %v927_v10 = vadd.f32 1.0, %v2768_v8  ;;  %v2770_v16 = vpop.eup %2769 }
 0x35e   :  { %2773 = vrcp.f32 %v921_v9  ;;  %v2772_v17 = vpop.eup %2771  ;;  %v934_v26 = vadd.f32 1.0, %v2770_v16 }
 0x35f   :  { %2775 = vrcp.f32 %v927_v10 }
 0x360   :  { %2777 = vrcp.f32 %v934_v26 }
 0x368   :  { %v2774_v19 = vpop.eup %2773 }
 0x369   :  { %v2776_v24 = vpop.eup %2775  ;;  %v938_v25 = vmul.f32 %v2774_v19, %v2772_v17 }
 0x36a   :  { %v937_v27 = vmul.f32 %v2776_v24, %v3380_v31  ;;  %v2778_v39 = vpop.eup %2777 }
 0x36c   :  { %v3426_v38 = vadd.f32 %v938_v25, %v937_v27 }
 0x36e   :  { %2779 = vtanh.f32 %v3426_v38 }
 0x378   :  { %v2780_v33 = vpop.eup %2779 }
 0x379   :  { %v3429_v45 = vmul.f32 %v2780_v33, %v2778_v39 }
 0x37b   :  { %1008 = vmatmul.mubr.f32.vlgmr.msra.gmra.mrb[6].mxu0 %v3429_v45  ;;  %1079 = vmatmul.mubr.f32.vlgmr.msra.gmra.mrb[6].mxu1 %v3429_v45 }
 0x37c   :  { %2373 = vmatpush1.bf16.msra.mxu0 %v3112_v21  ;;  %2405 = vmatpush1.bf16.msra.mxu1 %v3234_v29 }
 0x37d   :  { %2375 = vmatprep.subr.bf16.mxu0 %v3115_v22  ;;  %2407 = vmatprep.subr.bf16.mxu1 %v3237_v30 }
 0x37e   :  { %1178 = vmatprep.mubr.f32.mxu0 %v3008_v0  ;;  %1249 = vmatprep.mubr.f32.mxu1 %v3008_v0 }
 0x380   :  { %2377 = vmatpush1.bf16.msra.mxu0 %v3126_v28  ;;  %2409 = vmatpush1.bf16.msra.mxu1 %v3246_v36 }
 0x381   :  { %2379 = vmatprep.subr.bf16.mxu0 %v3129_v32  ;;  %2411 = vmatprep.subr.bf16.mxu1 %v3250_v37 }
 0x384   :  { %2381 = vmatpush1.bf16.msra.mxu0 %v3140_v42  ;;  %2413 = vmatpush1.bf16.msra.mxu1 %v3258_v43 }
 0x385   :  { %2383 = vmatprep.subr.bf16.mxu0 %v3143_v46  ;;  %2415 = vmatprep.subr.bf16.mxu1 %v3261_v44 }
 0x388   :  { %2385 = vmatpush1.bf16.msra.mxu0 %v3154_v54  ;;  %2417 = vmatpush1.bf16.msra.mxu1 %v3268_v50 }
 0x389   :  { %2387 = vmatprep.subr.bf16.mxu0 %v3157_v55  ;;  %2419 = vmatprep.subr.bf16.mxu1 %v3271_v51 }
 0x38c   :  { %2389 = vmatpush1.bf16.msra.mxu0 %v3169_v61  ;;  %2421 = vmatpush1.bf16.msra.mxu1 %v3278_v58 }
 0x38d   :  { %2391 = vmatprep.subr.bf16.mxu0 %v3172_v62  ;;  %2423 = vmatprep.subr.bf16.mxu1 %v3281_v59 }
 0x390   :  { %2393 = vmatpush1.bf16.msra.mxu0 %v3188_v5  ;;  %2425 = vmatpush1.bf16.msra.mxu1 %v3284_v3 }
 0x391   :  { %2395 = vmatprep.subr.bf16.mxu0 %v3191_v6  ;;  %2427 = vmatprep.subr.bf16.mxu1 %v3287_v4 }
 0x394   :  { %2397 = vmatpush1.bf16.msra.mxu0 %v3205_v12  ;;  %2429 = vmatpush1.bf16.msra.mxu1 %v3290_v11 }
 0x395   :  { %2399 = vmatprep.subr.bf16.mxu0 %v3208_v13  ;;  %2431 = vmatprep.subr.bf16.mxu1 %v3293_v14 }
 0x398   :  { %2401 = vmatpush1.bf16.msra.mxu0 %v3221_v20  ;;  %2433 = vmatpush1.bf16.msra.mxu1 %v3296_v18 }
 0x399   :  { %2435 = vmatprep.subr.bf16.mxu0 %v3105_v15  ;;  %2467 = vmatprep.subr.bf16.mxu1 %v3224_v23 }
 0x44e   :  { %v1009_v31 = vpop.f32.mrb[6].mxu0  ;;  %v1080_v47 = vpop.f32.mrb[6].mxu1 }
 0x44f   :  { %v2666_v48 = vadd.f32 %v1009_v31, %v3322_v34  ;;  %v1011_v49 = vpop.f32.mrb[7].mxu0  ;;  %v1082_v52 = vpop.f32.mrb[7].mxu1  ;;  %v2682_v7 = vadd.f32 %v1080_v47, %v3328_v63 }
 0x450   :  { %v2667_v53 = vadd.f32 %v1011_v49, %v3324_v35  ;;  %v2683_v60 = vadd.f32 %v1082_v52, %v3330_v2 }
 0x451   :  { %v2014_v56 = vmul.f32 -1.442695, %v2666_v48 }
 0x452   :  { %v2015_v57 = vmul.f32 -1.442695, %v2667_v53  ;;  %v2016_v1 = vmul.f32 -1.442695, %v2683_v60 }
 0x453   :  { %2781 = vpow2.f32 %v2014_v56 }
 0x454   :  { %2783 = vpow2.f32 %v2015_v57 }
 0x455   :  { %2785 = vpow2.f32 %v2016_v1 }
 0x456   :  { %2787 = vtanh.f32 %v2682_v7 }
 0x45d   :  { %v2782_v8 = vpop.eup %2781 }
 0x45e   :  { %v2784_v9 = vpop.eup %2783  ;;  %v1092_v10 = vadd.f32 1.0, %v2782_v8 }
 0x45f   :  { %v1098_v16 = vadd.f32 1.0, %v2784_v9  ;;  %v2786_v17 = vpop.eup %2785 }
 0x460   :  { %2789 = vrcp.f32 %v1092_v10  ;;  %v2788_v19 = vpop.eup %2787  ;;  %v1105_v27 = vadd.f32 1.0, %v2786_v17 }
 0x461   :  { %2791 = vrcp.f32 %v1098_v16 }
 0x462   :  { %2793 = vrcp.f32 %v1105_v27 }
 0x46a   :  { %v2790_v24 = vpop.eup %2789 }
 0x46b   :  { %v2792_v25 = vpop.eup %2791  ;;  %v1109_v26 = vmul.f32 %v2790_v24, %v2788_v19 }
 0x46c   :  { %v1108_v39 = vmul.f32 %v2792_v25, %v3426_v38  ;;  %v2794_v31 = vpop.eup %2793 }
 0x46e   :  { %v3472_v33 = vadd.f32 %v1109_v26, %v1108_v39 }
 0x470   :  { %2795 = vtanh.f32 %v3472_v33 }
 0x47a   :  { %v2796_v47 = vpop.eup %2795 }
 0x47b   :  { %v3475_v48 = vmul.f32 %v2796_v47, %v2794_v31 }
 0x47d   :  { %1179 = vmatmul.mubr.f32.vlgmr.msra.gmra.mrb[8].mxu0 %v3475_v48  ;;  %1250 = vmatmul.mubr.f32.vlgmr.msra.gmra.mrb[8].mxu1 %v3475_v48 }
 0x47e   :  { %2437 = vmatpush1.bf16.msra.mxu0 %v3112_v21  ;;  %2469 = vmatpush1.bf16.msra.mxu1 %v3234_v29 }
 0x47f   :  { %2439 = vmatprep.subr.bf16.mxu0 %v3115_v22  ;;  %2471 = vmatprep.subr.bf16.mxu1 %v3237_v30 }
 0x480   :  { %1349 = vmatprep.mubr.f32.mxu0 %v3008_v0  ;;  %1420 = vmatprep.mubr.f32.mxu1 %v3008_v0 }
 0x482   :  { %2441 = vmatpush1.bf16.msra.mxu0 %v3126_v28  ;;  %2473 = vmatpush1.bf16.msra.mxu1 %v3246_v36 }
 0x483   :  { %2443 = vmatprep.subr.bf16.mxu0 %v3129_v32  ;;  %2475 = vmatprep.subr.bf16.mxu1 %v3250_v37 }
 0x486   :  { %2445 = vmatpush1.bf16.msra.mxu0 %v3140_v42  ;;  %2477 = vmatpush1.bf16.msra.mxu1 %v3258_v43 }
 0x487   :  { %2447 = vmatprep.subr.bf16.mxu0 %v3143_v46  ;;  %2479 = vmatprep.subr.bf16.mxu1 %v3261_v44 }
 0x48a   :  { %2449 = vmatpush1.bf16.msra.mxu0 %v3154_v54  ;;  %2481 = vmatpush1.bf16.msra.mxu1 %v3268_v50 }
 0x48b   :  { %2451 = vmatprep.subr.bf16.mxu0 %v3157_v55  ;;  %2483 = vmatprep.subr.bf16.mxu1 %v3271_v51 }
 0x48e   :  { %2453 = vmatpush1.bf16.msra.mxu0 %v3169_v61  ;;  %2485 = vmatpush1.bf16.msra.mxu1 %v3278_v58 }
 0x48f   :  { %2455 = vmatprep.subr.bf16.mxu0 %v3172_v62  ;;  %2487 = vmatprep.subr.bf16.mxu1 %v3281_v59 }
 0x492   :  { %2457 = vmatpush1.bf16.msra.mxu0 %v3188_v5  ;;  %2489 = vmatpush1.bf16.msra.mxu1 %v3284_v3 }
 0x493   :  { %2459 = vmatprep.subr.bf16.mxu0 %v3191_v6  ;;  %2491 = vmatprep.subr.bf16.mxu1 %v3287_v4 }
 0x496   :  { %2461 = vmatpush1.bf16.msra.mxu0 %v3205_v12  ;;  %2493 = vmatpush1.bf16.msra.mxu1 %v3290_v11 }
 0x497   :  { %2463 = vmatprep.subr.bf16.mxu0 %v3208_v13  ;;  %2495 = vmatprep.subr.bf16.mxu1 %v3293_v14 }
 0x49a   :  { %2465 = vmatpush1.bf16.msra.mxu0 %v3221_v20  ;;  %2497 = vmatpush1.bf16.msra.mxu1 %v3296_v18 }
 0x49b   :  { %2499 = vmatprep.subr.bf16.mxu0 %v3105_v15  ;;  %2531 = vmatprep.subr.bf16.mxu1 %v3224_v23 }
 0x550   :  { %v1180_v38 = vpop.f32.mrb[8].mxu0  ;;  %v1251_v49 = vpop.f32.mrb[8].mxu1 }
 0x551   :  { %v2668_v52 = vadd.f32 %v1180_v38, %v3322_v34  ;;  %v1182_v53 = vpop.f32.mrb[9].mxu0  ;;  %v1253_v56 = vpop.f32.mrb[9].mxu1  ;;  %v2684_v9 = vadd.f32 %v1251_v49, %v3328_v63 }
 0x552   :  { %v2669_v57 = vadd.f32 %v1182_v53, %v3324_v35  ;;  %v2685_v7 = vadd.f32 %v1253_v56, %v3330_v2 }
 0x553   :  { %v2017_v60 = vmul.f32 -1.442695, %v2668_v52 }
 0x554   :  { %v2018_v1 = vmul.f32 -1.442695, %v2669_v57  ;;  %v2019_v8 = vmul.f32 -1.442695, %v2685_v7 }
 0x555   :  { %2797 = vpow2.f32 %v2017_v60 }
 0x556   :  { %2799 = vpow2.f32 %v2018_v1 }
 0x557   :  { %2801 = vpow2.f32 %v2019_v8 }
 0x558   :  { %2803 = vtanh.f32 %v2684_v9 }
 0x55f   :  { %v2798_v10 = vpop.eup %2797 }
 0x560   :  { %v2800_v16 = vpop.eup %2799  ;;  %v1263_v17 = vadd.f32 1.0, %v2798_v10 }
 0x561   :  { %v1269_v19 = vadd.f32 1.0, %v2800_v16  ;;  %v2802_v24 = vpop.eup %2801 }
 0x562   :  { %2805 = vrcp.f32 %v1263_v17  ;;  %v2804_v25 = vpop.eup %2803  ;;  %v1276_v31 = vadd.f32 1.0, %v2802_v24 }
 0x563   :  { %2807 = vrcp.f32 %v1269_v19 }
 0x564   :  { %2809 = vrcp.f32 %v1276_v31 }
 0x56c   :  { %v2806_v26 = vpop.eup %2805 }
 0x56d   :  { %v2808_v27 = vpop.eup %2807  ;;  %v1280_v39 = vmul.f32 %v2806_v26, %v2804_v25 }
 0x56e   :  { %v1279_v47 = vmul.f32 %v2808_v27, %v3472_v33  ;;  %v2810_v49 = vpop.eup %2809 }
 0x570   :  { %v3518_v38 = vadd.f32 %v1280_v39, %v1279_v47 }
 0x572   :  { %2811 = vtanh.f32 %v3518_v38 }
 0x57c   :  { %v2812_v52 = vpop.eup %2811 }
 0x57d   :  { %v3521_v53 = vmul.f32 %v2812_v52, %v2810_v49 }
 0x57f   :  { %1350 = vmatmul.mubr.f32.vlgmr.msra.gmra.mrb[10].mxu0 %v3521_v53  ;;  %1421 = vmatmul.mubr.f32.vlgmr.msra.gmra.mrb[10].mxu1 %v3521_v53 }
 0x580   :  { %2501 = vmatpush1.bf16.msra.mxu0 %v3112_v21  ;;  %2533 = vmatpush1.bf16.msra.mxu1 %v3234_v29 }
 0x581   :  { %2503 = vmatprep.subr.bf16.mxu0 %v3115_v22  ;;  %2535 = vmatprep.subr.bf16.mxu1 %v3237_v30 }
 0x582   :  { %1520 = vmatprep.mubr.f32.mxu0 %v3008_v0  ;;  %1591 = vmatprep.mubr.f32.mxu1 %v3008_v0 }
 0x584   :  { %2505 = vmatpush1.bf16.msra.mxu0 %v3126_v28  ;;  %2537 = vmatpush1.bf16.msra.mxu1 %v3246_v36 }
 0x585   :  { %2507 = vmatprep.subr.bf16.mxu0 %v3129_v32  ;;  %2539 = vmatprep.subr.bf16.mxu1 %v3250_v37 }
 0x588   :  { %2509 = vmatpush1.bf16.msra.mxu0 %v3140_v42  ;;  %2541 = vmatpush1.bf16.msra.mxu1 %v3258_v43 }
 0x589   :  { %2511 = vmatprep.subr.bf16.mxu0 %v3143_v46  ;;  %2543 = vmatprep.subr.bf16.mxu1 %v3261_v44 }
 0x58c   :  { %2513 = vmatpush1.bf16.msra.mxu0 %v3154_v54  ;;  %2545 = vmatpush1.bf16.msra.mxu1 %v3268_v50 }
 0x58d   :  { %2515 = vmatprep.subr.bf16.mxu0 %v3157_v55  ;;  %2547 = vmatprep.subr.bf16.mxu1 %v3271_v51 }
 0x590   :  { %2517 = vmatpush1.bf16.msra.mxu0 %v3169_v61  ;;  %2549 = vmatpush1.bf16.msra.mxu1 %v3278_v58 }
 0x591   :  { %2519 = vmatprep.subr.bf16.mxu0 %v3172_v62  ;;  %2551 = vmatprep.subr.bf16.mxu1 %v3281_v59 }
 0x594   :  { %2521 = vmatpush1.bf16.msra.mxu0 %v3188_v5  ;;  %2553 = vmatpush1.bf16.msra.mxu1 %v3284_v3 }
 0x595   :  { %2523 = vmatprep.subr.bf16.mxu0 %v3191_v6  ;;  %2555 = vmatprep.subr.bf16.mxu1 %v3287_v4 }
 0x598   :  { %2525 = vmatpush1.bf16.msra.mxu0 %v3205_v12  ;;  %2557 = vmatpush1.bf16.msra.mxu1 %v3290_v11 }
 0x599   :  { %2527 = vmatprep.subr.bf16.mxu0 %v3208_v13  ;;  %2559 = vmatprep.subr.bf16.mxu1 %v3293_v14 }
 0x59c   :  { %2529 = vmatpush1.bf16.msra.mxu0 %v3221_v20  ;;  %2561 = vmatpush1.bf16.msra.mxu1 %v3296_v18 }
 0x59d   :  { %2563 = vmatprep.subr.bf16.mxu0 %v3105_v15  ;;  %2595 = vmatprep.subr.bf16.mxu1 %v3224_v23 }
 0x652   :  { %v1351_v33 = vpop.f32.mrb[10].mxu0  ;;  %v1422_v56 = vpop.f32.mrb[10].mxu1 }
 0x653   :  { %v2670_v57 = vadd.f32 %v1351_v33, %v3322_v34  ;;  %v1353_v60 = vpop.f32.mrb[11].mxu0  ;;  %v1424_v1 = vpop.f32.mrb[11].mxu1  ;;  %v2686_v17 = vadd.f32 %v1422_v56, %v3328_v63 }
 0x654   :  { %v2671_v7 = vadd.f32 %v1353_v60, %v3324_v35  ;;  %v2687_v10 = vadd.f32 %v1424_v1, %v3330_v2  ;;  %v1812_v60 = vld [vmem:[#allocation8 + $0x20] sm:$0xff]  ;;  %v1813_v1 = vld [vmem:[#allocation8 + $0x28] sm:$0xff] }
 0x655   :  { %v2020_v8 = vmul.f32 -1.442695, %v2670_v57 }
 0x656   :  { %v2021_v9 = vmul.f32 -1.442695, %v2671_v7  ;;  %v2022_v16 = vmul.f32 -1.442695, %v2687_v10  ;;  %v2634_v7 = vpack.c.bf16 %v1813_v1, %v1812_v60 }
 0x657   :  { %2813 = vpow2.f32 %v2020_v8  ;;  %v1814_v8 = vld [vmem:[#allocation8 + $0x30] sm:$0xff] }
 0x658   :  { %2815 = vpow2.f32 %v2021_v9  ;;  %v1815_v9 = vld [vmem:[#allocation8 + $0x38] sm:$0xff] }
 0x659   :  { %2817 = vpow2.f32 %v2022_v16  ;;  %v2638_v10 = vpack.c.bf16 %v1815_v9, %v1814_v8  ;;  %v1816_v16 = vld [vmem:[#allocation8 + $0x40] sm:$0xff] }
 0x65a   :  { %2819 = vtanh.f32 %v2686_v17  ;;  %v1817_v17 = vld [vmem:[#allocation8 + $0x48] sm:$0xff] }
 0x661   :  { %v2814_v15 = vpop.eup %2813 }
 0x662   :  { %v2816_v19 = vpop.eup %2815  ;;  %v1434_v23 = vadd.f32 1.0, %v2814_v15  ;;  %v2642_v15 = vpack.c.bf16 %v1817_v17, %v1816_v16 }
 0x663   :  { %v1440_v24 = vadd.f32 1.0, %v2816_v19  ;;  %v2818_v25 = vpop.eup %2817  ;;  %v1818_v19 = vld [vmem:[#allocation8 + $0x50] sm:$0xff] }
 0x664   :  { %2821 = vrcp.f32 %v1434_v23  ;;  %v2820_v26 = vpop.eup %2819  ;;  %v1447_v47 = vadd.f32 1.0, %v2818_v25  ;;  %v1819_v23 = vld [vmem:[#allocation8 + $0x58] sm:$0xff]  ;;  %v1820_v25 = vld [vmem:[#allocation8 + $0x60] sm:$0xff] }
 0x665   :  { %2823 = vrcp.f32 %v1440_v24  ;;  %v2646_v24 = vpack.c.bf16 %v1819_v23, %v1818_v19 }
 0x666   :  { %2825 = vrcp.f32 %v1447_v47 }
 0x66e   :  { %v2822_v27 = vpop.eup %2821 }
 0x66f   :  { %v2824_v39 = vpop.eup %2823  ;;  %v1451_v31 = vmul.f32 %v2822_v27, %v2820_v26  ;;  %v1821_v26 = vld [vmem:[#allocation8 + $0x68] sm:$0xff]  ;;  %v1822_v27 = vld [vmem:[#allocation8 + $0x70] sm:$0xff] }
 0x670   :  { %v1450_v49 = vmul.f32 %v2824_v39, %v3518_v38  ;;  %v2826_v33 = vpop.eup %2825  ;;  %v1823_v39 = vld [vmem:[#allocation8 + $0x78] sm:$0xff] }
 0x672   :  { %v3564_v52 = vadd.f32 %v1451_v31, %v1450_v49  ;;  %v2654_v31 = vpack.c.bf16 %v1823_v39, %v1822_v27 }
 0x674   :  { %2827 = vtanh.f32 %v3564_v52 }
 0x67e   :  { %v2828_v56 = vpop.eup %2827 }
 0x67f   :  { %v3567_v57 = vmul.f32 %v2828_v56, %v2826_v33 }
 0x681   :  { %1521 = vmatmul.mubr.f32.vlgmr.msra.gmra.mrb[12].mxu0 %v3567_v57  ;;  %1592 = vmatmul.mubr.f32.vlgmr.msra.gmra.mrb[12].mxu1 %v3567_v57 }
 0x682   :  { %2565 = vmatpush1.bf16.msra.mxu0 %v3112_v21  ;;  %2597 = vmatpush1.bf16.msra.mxu1 %v3234_v29  ;;  %v1809_v21 = vld [vmem:[#allocation8 + $0x8] sm:$0xff] }
 0x683   :  { %2567 = vmatprep.subr.bf16.mxu0 %v3115_v22  ;;  %2599 = vmatprep.subr.bf16.mxu1 %v3237_v30 }
 0x684   :  { %1691 = vmatprep.mubr.f32.mxu0 %v3008_v0  ;;  %1762 = vmatprep.mubr.f32.mxu1 %v3008_v0  ;;  %v1808_v0 = vld [vmem:[#allocation8] sm:$0xff] }
 0x685   :  { %v2626_v22 = vpack.c.bf16 %v1809_v21, %v1808_v0 }
 0x686   :  { %2569 = vmatpush1.bf16.msra.mxu0 %v3126_v28  ;;  %2601 = vmatpush1.bf16.msra.mxu1 %v3246_v36 }
 0x687   :  { %2571 = vmatprep.subr.bf16.mxu0 %v3129_v32  ;;  %2603 = vmatprep.subr.bf16.mxu1 %v3250_v37 }
 0x68a   :  { %2573 = vmatpush1.bf16.msra.mxu0 %v3140_v42  ;;  %2605 = vmatpush1.bf16.msra.mxu1 %v3258_v43 }
 0x68b   :  { %2575 = vmatprep.subr.bf16.mxu0 %v3143_v46  ;;  %2607 = vmatprep.subr.bf16.mxu1 %v3261_v44 }
 0x68e   :  { %2577 = vmatpush1.bf16.msra.mxu0 %v3154_v54  ;;  %2609 = vmatpush1.bf16.msra.mxu1 %v3268_v50 }
 0x68f   :  { %2579 = vmatprep.subr.bf16.mxu0 %v3157_v55  ;;  %2611 = vmatprep.subr.bf16.mxu1 %v3271_v51 }
 0x692   :  { %2581 = vmatpush1.bf16.msra.mxu0 %v3169_v61  ;;  %2613 = vmatpush1.bf16.msra.mxu1 %v3278_v58 }
 0x693   :  { %2583 = vmatprep.subr.bf16.mxu0 %v3172_v62  ;;  %2615 = vmatprep.subr.bf16.mxu1 %v3281_v59 }
 0x696   :  { %2585 = vmatpush1.bf16.msra.mxu0 %v3188_v5  ;;  %2617 = vmatpush1.bf16.msra.mxu1 %v3284_v3  ;;  %v1810_v3 = vld [vmem:[#allocation8 + $0x10] sm:$0xff] }
 0x697   :  { %2587 = vmatprep.subr.bf16.mxu0 %v3191_v6  ;;  %2619 = vmatprep.subr.bf16.mxu1 %v3287_v4  ;;  %v1811_v4 = vld [vmem:[#allocation8 + $0x18] sm:$0xff] }
 0x698   :  { %v2630_v38 = vpack.c.bf16 %v1811_v4, %v1810_v3 }
 0x69a   :  { %2589 = vmatpush1.bf16.msra.mxu0 %v3205_v12  ;;  %2621 = vmatpush1.bf16.msra.mxu1 %v3290_v11 }
 0x69b   :  { %2591 = vmatprep.subr.bf16.mxu0 %v3208_v13  ;;  %2623 = vmatprep.subr.bf16.mxu1 %v3293_v14 }
 0x69e   :  { %2593 = vmatpush1.bf16.msra.mxu0 %v3221_v20  ;;  %2625 = vmatpush1.bf16.msra.mxu1 %v3296_v18 }
 0x69f   :  { %2627 = vmatprep.subr.bf16.mxu0 %v2626_v22 }
 0x754   :  { %v1522_v28 = vpop.f32.mrb[12].mxu0  ;;  %v1593_v32 = vpop.f32.mrb[12].mxu1 }
 0x755   :  { %v2672_v42 = vadd.f32 %v1522_v28, %v3322_v34  ;;  %v1524_v46 = vpop.f32.mrb[13].mxu0  ;;  %v1595_v54 = vpop.f32.mrb[13].mxu1  ;;  %v2688_v12 = vadd.f32 %v1593_v32, %v3328_v63 }
 0x756   :  { %v2673_v55 = vadd.f32 %v1524_v46, %v3324_v35  ;;  %v2689_v5 = vadd.f32 %v1595_v54, %v3330_v2 }
 0x757   :  { %v2023_v61 = vmul.f32 -1.442695, %v2672_v42 }
 0x758   :  { %v2024_v62 = vmul.f32 -1.442695, %v2673_v55  ;;  %v2025_v6 = vmul.f32 -1.442695, %v2689_v5 }
 0x759   :  { %2829 = vpow2.f32 %v2023_v61 }
 0x75a   :  { %2831 = vpow2.f32 %v2024_v62 }
 0x75b   :  { %2833 = vpow2.f32 %v2025_v6 }
 0x75c   :  { %2835 = vtanh.f32 %v2688_v12 }
 0x763   :  { %v2830_v13 = vpop.eup %2829 }
 0x764   :  { %v2832_v20 = vpop.eup %2831  ;;  %v1605_v29 = vadd.f32 1.0, %v2830_v13 }
 0x765   :  { %v1611_v30 = vadd.f32 1.0, %v2832_v20  ;;  %v2834_v36 = vpop.eup %2833 }
 0x766   :  { %2837 = vrcp.f32 %v1605_v29  ;;  %v2836_v37 = vpop.eup %2835  ;;  %v1618_v51 = vadd.f32 1.0, %v2834_v36 }
 0x767   :  { %2839 = vrcp.f32 %v1611_v30 }
 0x768   :  { %2841 = vrcp.f32 %v1618_v51 }
 0x770   :  { %v2838_v43 = vpop.eup %2837 }
 0x771   :  { %v2840_v44 = vpop.eup %2839  ;;  %v1622_v50 = vmul.f32 %v2838_v43, %v2836_v37 }
 0x772   :  { %v1621_v58 = vmul.f32 %v2840_v44, %v3564_v52  ;;  %v2842_v11 = vpop.eup %2841 }
 0x774   :  { %v3608_v59 = vadd.f32 %v1622_v50, %v1621_v58 }
 0x776   :  { %2843 = vtanh.f32 %v3608_v59 }
 0x780   :  { %v2844_v14 = vpop.eup %2843 }
 0x781   :  { %v1625_v18 = vmul.f32 %v2844_v14, %v2842_v11 }
 0x783   :  { %1692 = vmatmul.mubr.f32.vlgmr.msra.gmra.mrb[14].mxu0 %v1625_v18  ;;  %1763 = vmatmul.mubr.f32.vlgmr.msra.gmra.mrb[14].mxu1 %v1625_v18 }
 0x784   :  { %2629 = vmatpush3.bf16.msra.mxu0 %v2626_v22  ;;  %2086 = vmatprep.mubr.f32.mxu0 %v3337_v40  ;;  %v2650_v40 = vpack.c.bf16 %v1821_v26, %v1820_v25 }
 0x785   :  { %2631 = vmatprep.subr.bf16.mxu0 %v2630_v38 }
 0x788   :  { %2633 = vmatpush3.bf16.msra.mxu0 %v2630_v38 }
 0x789   :  { %2635 = vmatprep.subr.bf16.mxu0 %v2634_v7 }
 0x78c   :  { %2637 = vmatpush3.bf16.msra.mxu0 %v2634_v7 }
 0x78d   :  { %2639 = vmatprep.subr.bf16.mxu0 %v2638_v10 }
 0x790   :  { %2641 = vmatpush3.bf16.msra.mxu0 %v2638_v10 }
 0x791   :  { %2643 = vmatprep.subr.bf16.mxu0 %v2642_v15 }
 0x794   :  { %2645 = vmatpush3.bf16.msra.mxu0 %v2642_v15 }
 0x795   :  { %2647 = vmatprep.subr.bf16.mxu0 %v2646_v24 }
 0x798   :  { %2649 = vmatpush3.bf16.msra.mxu0 %v2646_v24 }
 0x799   :  { %2651 = vmatprep.subr.bf16.mxu0 %v2650_v40 }
 0x79c   :  { %2653 = vmatpush3.bf16.msra.mxu0 %v2650_v40 }
 0x79d   :  { %2655 = vmatprep.subr.bf16.mxu0 %v2654_v31 }
 0x7a0   :  { %2657 = vmatpush3.bf16.msra.mxu0 %v2654_v31 }
 0x7a3   :  { %2087 = vmatmul.mubr.f32.vlgmr.msra.gmra.mrb[16].mxu0 %v3383_v41 }
 0x7a4   :  { %2089 = vmatprep.mubr.f32.mxu0 %v3429_v45 }
 0x7a7   :  { %2090 = vmatmul.mubr.f32.gmra.mrb[18].mxu0 %v3475_v48 }
 0x7a8   :  { %2092 = vmatprep.mubr.f32.mxu0 %v3521_v53 }
 0x7ab   :  { %2093 = vmatmul.mubr.f32.gmra.mrb[20].mxu0 %v3567_v57 }
 0x7ac   :  { %2095 = vmatprep.mubr.f32.mxu0 %v1625_v18 }
 0x856   :  { %v1693_v47 = vpop.f32.mrb[14].mxu0  ;;  %v1764_v49 = vpop.f32.mrb[14].mxu1 }
 0x857   :  { %v2674_v52 = vadd.f32 %v1693_v47, %v3322_v34  ;;  %v1695_v33 = vpop.f32.mrb[15].mxu0  ;;  %v1766_v56 = vpop.f32.mrb[15].mxu1  ;;  %v2690_v48 = vadd.f32 %v1764_v49, %v3328_v63  ;;  %v3625_v63 = vld [vmem:[%s3679_s5] ss:$0 sm:$0xff]  ;;  %s3009_s5 = smov [#allocation10]  }
 0x858   :  { %v2675_v0 = vadd.f32 %v1695_v33, %v3324_v35  ;;  %v2691_v41 = vadd.f32 %v1766_v56, %v3330_v2  ;;  %s1962_s16 = sshll.u32 %s3009_s5, 4  ;;  %s1963_s16 = int_to_ptr.vmem [resolvable:$true] %s1962_s16 }
 0x859   :  { %v2026_v21 = vmul.f32 -1.442695, %v2674_v52  ;;  %s2927_s19 = scalar_lea.vmem %s1963_s16, 128  ;;  %p2932_p11 = scmp.lt.s32.totalorder %s1963_s16, %s1963_s16 }
 0x85a   :  { %v2027_v22 = vmul.f32 -1.442695, %v2675_v0  ;;  %v2028_v45 = vmul.f32 -1.442695, %v2691_v41  ;;  %p2928_p10 = scmp.ne.s32.totalorder %s1963_s16, %s2927_s19  ;;  %p2933_p12 = scmp.lt.s32.totalorder %s2927_s19, %s2927_s19 }
 0x85b   :  { %2845 = vpow2.f32 %v2026_v21 }
 0x85c   :  { %2847 = vpow2.f32 %v2027_v22  ;;  %p2934_p13 = por %p2933_p12, %p2932_p11 }
 0x85d   :  { %2849 = vpow2.f32 %v2028_v45 }
 0x85e   :  { %2851 = vtanh.f32 %v2690_v48  ;;  %p2935_p0 = pnand %p2934_p13, %p2928_p10 }
 0x865   :  { %v2846_v53 = vpop.eup %2845 }
 0x866   :  { %v2848_v57 = vpop.eup %2847  ;;  %v1776_v28 = vadd.f32 1.0, %v2846_v53 }
 0x867   :  { %v1782_v32 = vadd.f32 1.0, %v2848_v57  ;;  %v2850_v34 = vpop.eup %2849 }
 0x868   :  { %2853 = vrcp.f32 %v1776_v28  ;;  %v2852_v42 = vpop.eup %2851  ;;  %v1789_v55 = vadd.f32 1.0, %v2850_v34 }
 0x869   :  { %2855 = vrcp.f32 %v1782_v32 }
 0x86a   :  { %2857 = vrcp.f32 %v1789_v55 }
 0x872   :  { %v2854_v35 = vpop.eup %2853 }
 0x873   :  { %v2856_v46 = vpop.eup %2855  ;;  %v1793_v54 = vmul.f32 %v2854_v35, %v2852_v42 }
 0x874   :  { %v1792_v61 = vmul.f32 %v2856_v46, %v3608_v59  ;;  %v2858_v50 = vpop.eup %2857 }
 0x876   :  { %v2088_v2 = vpop.f32.mrb[16].mxu0  ;;  %v1794_v62 = vadd.f32 %v1793_v54, %v1792_v61 }
 0x877   :  { %v1903_v5 = vadd.f32 %v2088_v2, %v3625_v63  ;;  %v1897_v6 = vpop.f32.mrb[17].mxu0 }
 0x878   :  { %v1898_v12 = vadd.f32 %v3625_v63, %v1897_v6  ;;  %2859 = vtanh.f32 %v1794_v62  ;;  %1799 = vst [vmem:[#allocation12] sm:$0xff] %v1794_v62 }
 0x879   :  { %1937 = vst [vmem:[#allocation9 + $0x8] sm:$0xff] %v1903_v5 }
 0x87a   :  { %1936 = vst [vmem:[#allocation9] sm:$0xff] %v1898_v12  ;;  %v2091_v13 = vpop.f32.mrb[18].mxu0 }
 0x87b   :  { %v1913_v20 = vadd.f32 %v2091_v13, %v3625_v63  ;;  %v1907_v29 = vpop.f32.mrb[19].mxu0 }
 0x87c   :  { %v1908_v30 = vadd.f32 %v3625_v63, %v1907_v29 }
 0x87d   :  { %1939 = vst [vmem:[#allocation9 + $0x18] sm:$0xff] %v1913_v20 }
 0x87e   :  { %1938 = vst [vmem:[#allocation9 + $0x10] sm:$0xff] %v1908_v30  ;;  %v2094_v36 = vpop.f32.mrb[20].mxu0 }
 0x87f   :  { %v1923_v37 = vadd.f32 %v2094_v36, %v3625_v63  ;;  %v1917_v43 = vpop.f32.mrb[21].mxu0 }
 0x880   :  { %v1918_v44 = vadd.f32 %v3625_v63, %v1917_v43 }
 0x881   :  { %1941 = vst [vmem:[#allocation9 + $0x28] sm:$0xff] %v1923_v37 }
 0x882   :  { %v2860_v51 = vpop.eup %2859  ;;  %1940 = vst [vmem:[#allocation9 + $0x20] sm:$0xff] %v1918_v44 }
 0x883   :  { %v1796_v58 = vmul.f32 %v2860_v51, %v2858_v50 }
 0x885   :  { %2096 = vmatmul.mubr.f32.gmra.mrb[22].mxu0 %v1796_v58  ;;  %1798 = vst [vmem:[#allocation10] sm:$0xff] %v1796_v58 }
 0x886   :  { %2938 = shalt.err (!%p2935_p0)
}
 0x887   :  { %s2939_s18 = scalar_lea.hbm %s3681_s7, 128 }
 0x888   :  { %p2940_p1 = scmp.ne.s32.totalorder %s3681_s7, %s2939_s18  ;;  %p2943_p2 = scmp.lt.u32.totalorder %s2939_s18, %s3681_s7 }
 0x88a   :  { %p2945_p3 = pnand %p2943_p2, %p2940_p1 }
 0x88c   :  { %2948 = shalt.err (!%p2945_p3)
}
 0x88d   :  { %1965 = dma.vmem_to_hbm [thread:$0]  %s1963_s16, 128, %s3681_s7, [#allocation11]  }
 0x88e   :  { %s3010_s26 = smov [#allocation12]  }
 0x88f   :  { %s1972_s27 = sshll.u32 %s3010_s26, 4  ;;  %s1973_s27 = int_to_ptr.vmem [resolvable:$true] %s1972_s27 }
 0x890   :  { %s2949_s29 = scalar_lea.vmem %s1973_s27, 128  ;;  %p2954_p5 = scmp.lt.s32.totalorder %s1973_s27, %s1973_s27 }
 0x891   :  { %p2950_p4 = scmp.ne.s32.totalorder %s1973_s27, %s2949_s29  ;;  %p2955_p6 = scmp.lt.s32.totalorder %s2949_s29, %s2949_s29 }
 0x893   :  { %p2956_p7 = por %p2955_p6, %p2954_p5 }
 0x895   :  { %p2957_p8 = pnand %p2956_p7, %p2950_p4 }
 0x897   :  { %2960 = shalt.err (!%p2957_p8)
}
 0x898   :  { %s2961_s9 = scalar_lea.hbm %s3682_s8, 128 }
 0x899   :  { %p2962_p9 = scmp.ne.s32.totalorder %s3682_s8, %s2961_s9  ;;  %p2965_p10 = scmp.lt.u32.totalorder %s2961_s9, %s3682_s8 }
 0x89b   :  { %p2967_p11 = pnand %p2965_p10, %p2962_p9 }
 0x89d   :  { %2970 = shalt.err (!%p2967_p11)
}
 0x89e   :  { %1975 = dma.vmem_to_hbm [thread:$0]  %s1973_s27, 128, %s3682_s8, [#allocation11]  }
 0x89f   :  { %s3011_s14 = smov [#allocation9]  }
 0x8a0   :  { %s1949_s3 = sshll.u32 %s3011_s14, 4  ;;  %s1950_s3 = int_to_ptr.vmem [resolvable:$true] %s1949_s3 }
 0x8a1   :  { %s2971_s15 = scalar_lea.vmem %s1950_s3, 1024  ;;  %p2976_p13 = scmp.lt.s32.totalorder %s1950_s3, %s1950_s3 }
 0x8a2   :  { %p2972_p12 = scmp.ne.s32.totalorder %s1950_s3, %s2971_s15  ;;  %p2977_p0 = scmp.lt.s32.totalorder %s2971_s15, %s2971_s15 }
 0x8a4   :  { %p2978_p1 = por %p2977_p0, %p2976_p13 }
 0x8a6   :  { %p2979_p2 = pnand %p2978_p1, %p2972_p12 }
 0x958   :  { %v2097_v59 = vpop.f32.mrb[22].mxu0 }
 0x959   :  { %v1933_v3 = vadd.f32 %v2097_v59, %v3625_v63  ;;  %v1927_v4 = vpop.f32.mrb[23].mxu0 }
 0x95a   :  { %v1928_v11 = vadd.f32 %v3625_v63, %v1927_v4 }
 0x95b   :  { %1943 = vst [vmem:[#allocation9 + $0x38] sm:$0xff] %v1933_v3 }
 0x95c   :  { %1942 = vst [vmem:[#allocation9 + $0x30] sm:$0xff] %v1928_v11 }
 0x95d   :  { %2982 = shalt.err (!%p2979_p2)
}
 0x95e   :  { %s2983_s16 = scalar_lea.hbm %s3680_s6, 1024 }
 0x95f   :  { %p2984_p3 = scmp.ne.s32.totalorder %s3680_s6, %s2983_s16  ;;  %p2987_p4 = scmp.lt.u32.totalorder %s2983_s16, %s3680_s6 }
 0x961   :  { %p2989_p5 = pnand %p2987_p4, %p2984_p3 }
 0x963   :  { %2992 = shalt.err (!%p2989_p5)
}
 0x964   :  { %1955 = dma.vmem_to_hbm [thread:$0]  %s1950_s3, 1024, %s3680_s6, [#allocation5], %s3006_s1, %s3006_s1, %s3007_s30  }
 0x965   :  { %2997 = dma.done.wait [#allocation5], 1024  }
 0x966   :  { %2998 = vsyncadd [#allocation5], 4294966272 }
 0x967   :  { %2999 = dma.done.wait [#allocation11], 256  }
 0x968   :  { %3000 = vsyncadd [#allocation11], 4294967040 }
 0x969   :  { %1985 = vsyncpa [#allocation4], 1 }
 0x96a   :  { %1986 = vsyncpa [#allocation7], 1 }
 0x96b   :  { %1987 = vsyncpa [#allocation5], 1 }
 0x96c   :  { %1988 = vsyncpa [#allocation11], 1 }

</bundles_post_ra>
